<compile_context>
chip_gen: v5e
topology: v5e:2x2
jax: 0.10.0
libtpu: 0.0.40
codegen_flags: <defaults>
</compile_context>

<pallas_src>
import functools

import jax
import jax.numpy as jnp
from jax import lax
from jax.experimental import pallas as pl
from jax.experimental.pallas import tpu as pltpu


def _layernorm(x, gamma, beta, eps=1e-5):
    mean = jnp.mean(x, axis=-1, keepdims=True)
    var = jnp.mean((x - mean) ** 2, axis=-1, keepdims=True)
    return (x - mean) * lax.rsqrt(var + eps) * gamma + beta


def encoder_block_kernel(
    # inputs
    x_ref, wqkv_ref, bqkv_ref, wo_ref, lnv_ref, amask_ref,
    gw_ref, gb_ref, cole_ref, sel_ref,
    ew1_ref, eb1_ref, ew2_ref, eb2_ref,
    # outputs
    out_ref, gates_ref,
    *, num_heads, head_dim, n_gates, top_k, e_pad,
):
    _, T, D = x_ref.shape
    H, dh = num_heads, head_dim
    HD = H * dh
    G, EP = n_gates, e_pad
    bf16 = jnp.bfloat16

    x = x_ref[0]                                  # (T, D) f32 residual path
    x_bf = x.astype(bf16)

    # ---------------- fused QKV projection (scale folded into wq) -----------
    qkv = jnp.dot(x_bf, wqkv_ref[...],
                  preferred_element_type=jnp.float32) + bqkv_ref[...]

    # head-major layout for ONE batched attention einsum per stage
    q = jnp.swapaxes(qkv[:, 0:HD].reshape(T, H, dh), 0, 1).astype(bf16)        # (H,T,dh)
    k = jnp.swapaxes(qkv[:, HD:2 * HD].reshape(T, H, dh), 0, 1).astype(bf16)
    v = jnp.swapaxes(qkv[:, 2 * HD:3 * HD].reshape(T, H, dh), 0, 1).astype(bf16)

    s = jnp.einsum('hqd,hkd->hqk', q, k,
                   preferred_element_type=jnp.float32)                          # (H,T,T)
    s = s + amask_ref[...]                        # additive causal mask (0 / -1e30)
    m = jnp.max(s, axis=-1, keepdims=True)
    e = jnp.exp(s - m)
    p = e * pl.reciprocal(jnp.sum(e, axis=-1, keepdims=True), approx=True)
    attn = jnp.einsum('hqk,hkd->hqd', p.astype(bf16), v,
                      preferred_element_type=jnp.float32)                        # (H,T,dh)
    attn = jnp.swapaxes(attn, 0, 1).reshape(T, HD)                               # (T, HD)

    bo = lnv_ref[0:1, :]
    g1, b1 = lnv_ref[1:2, :], lnv_ref[2:3, :]
    g2, b2 = lnv_ref[3:4, :], lnv_ref[4:5, :]

    proj = jnp.dot(attn.astype(bf16), wo_ref[...],
                   preferred_element_type=jnp.float32) + bo
    normed1 = _layernorm(proj + x, g1, b1)        # f32
    n1_bf = normed1.astype(bf16)

    # ----------------- MoE: one fused gate matmul for ALL gates -------------
    # padded expert columns carry a -1e30 bias -> softmax prob exactly 0
    logits_all = jnp.dot(n1_bf, gw_ref[...],
                         preferred_element_type=jnp.float32) + gb_ref[...]       # (T, G*EP)

    col_e = cole_ref[...]                          # (1, EP) f32 lane iota
    sel = sel_ref[...]                             # (EP, E*M) 0/1 selection matrix
    inv_g = 1.0 / float(G)

    moe_acc = jnp.zeros((T, D), jnp.float32)
    for g in range(G):
        logits = logits_all[:, g * EP:(g + 1) * EP]        # 128-aligned slice
        lm = jnp.max(logits, axis=-1, keepdims=True)
        ex = jnp.exp(logits - lm)
        probs = ex / jnp.sum(ex, axis=-1, keepdims=True)   # exact (externally visible)
        gates_ref[0, g] = probs                            # full-lane (T, 128) store

        # top-k mask (iterative arg-max, smallest-index tie-break)
        remaining = probs
        mask = jnp.zeros((T, EP), jnp.float32)
        for _ in range(top_k):
            mmax = jnp.max(remaining, axis=-1, keepdims=True)
            is_max = remaining == mmax
            first = jnp.min(jnp.where(is_max, col_e, float(EP)),
                            axis=-1, keepdims=True)
            onehot = (col_e == first).astype(jnp.float32)
            mask = jnp.maximum(mask, onehot)
            remaining = jnp.where(onehot > 0, -1.0, remaining)

        w = probs * mask
        w = w / jnp.sum(w, axis=-1, keepdims=True)         # exact renormalize
        w = w * inv_g                                      # fold 1/n_gates average

        # dense fused expert FFN (toy E; see TODO(synk) on routed matmuls)
        h1 = jnp.dot(n1_bf, ew1_ref[g],
                     preferred_element_type=jnp.float32) + eb1_ref[g]            # (T, E*M)
        h1 = jnp.maximum(h1, 0.0)                                                # ReLU
        # f32 selection broadcast via tiny MXU matmul (f32 multi-pass cost accepted
        # knowingly to keep routing weights exact)
        w_exp = jnp.dot(w, sel, preferred_element_type=jnp.float32)              # (T, E*M)
        h1w = (h1 * w_exp).astype(bf16)
        gate_out = jnp.dot(h1w, ew2_ref[g],
                           preferred_element_type=jnp.float32)                   # (T, D)
        gate_out = gate_out + jnp.dot(w, ew2b := eb2_ref[g],
                                      preferred_element_type=jnp.float32)
        moe_acc = moe_acc + gate_out

    out_ref[0] = _layernorm(moe_acc + normed1, g2, b2)


def pack_params(params, *, num_heads, head_dim, n_gates, n_experts, moe_dim, seq_len):
    """One-time weight repacking (hoisted out of the per-call path)."""
    (wq, bq, wk, bk, wv, bv, wo, bo, g1, b1, g2, b2,
     gw, gb, ew1, eb1, ew2, eb2) = params
    D = wq.shape[0]
    G, E, M = n_gates, n_experts, moe_dim
    EP = max(128, ((E + 127) // 128) * 128)       # lane-dense expert padding
    T = seq_len
    bf16 = jnp.bfloat16
    scale = 1.0 / float(head_dim) ** 0.5

    wqkv = jnp.concatenate([wq * scale, wk, wv], axis=1).astype(bf16)   # (D, 3HD)
    bqkv = jnp.concatenate([bq * scale, bk, bv], axis=1)                # (1, 3HD) f32
    wo_b = wo.astype(bf16)                                              # (HD, D)
    lnv = jnp.concatenate([bo, g1, b1, g2, b2], axis=0)                 # (5, D)

    # additive causal mask (block_size = seq_len)
    row = jnp.arange(T)[:, None]
    col = jnp.arange(T)[None, :]
    amask = jnp.where(row >= col, 0.0, -1e30).astype(jnp.float32)[None] # (1, T, T)

    # gates padded to EP experts; padded columns get -1e30 bias -> prob 0
    gw_pad = jnp.zeros((G, D, EP), jnp.float32).at[:, :, :E].set(gw)
    gb_pad = jnp.full((G, EP), -1e30, jnp.float32).at[:, :E].set(gb)
    gw_all = jnp.transpose(gw_pad, (1, 0, 2)).reshape(D, G * EP).astype(bf16)
    gb_all = gb_pad.reshape(1, G * EP)

    cole = jnp.arange(EP, dtype=jnp.float32).reshape(1, EP)
    sel = (jnp.arange(E * M) // M ==
           jnp.arange(EP)[:, None]).astype(jnp.float32)                 # (EP, E*M)

    ew1p = jnp.transpose(ew1, (0, 2, 1, 3)).reshape(G, D, E * M).astype(bf16)
    eb1p = eb1.reshape(G, 1, E * M)
    ew2p = ew2.reshape(G, E * M, D).astype(bf16)
    eb2p = jnp.zeros((G, EP, D), jnp.float32).at[:, :E, :].set(eb2)

    packed = (wqkv, bqkv, wo_b, lnv, amask, gw_all, gb_all, cole, sel,
              ew1p, eb1p, ew2p, eb2p)
    return packed, EP


def encoder_block(x, packed, *, num_heads, head_dim, n_gates, n_experts,
                  top_k, e_pad):
    B, T, D = x.shape
    G, E, EP = n_gates, n_experts, e_pad

    kernel = functools.partial(
        encoder_block_kernel, num_heads=num_heads, head_dim=head_dim,
        n_gates=G, top_k=top_k, e_pad=EP)

    inputs = (x,) + packed

    def resident(a):
        nd = a.ndim
        return pl.BlockSpec(a.shape, lambda b, _nd=nd: (0,) * _nd)

    in_specs = ([pl.BlockSpec((1, T, D), lambda b: (b, 0, 0))]
                + [resident(a) for a in packed])

    out_shape = (
        jax.ShapeDtypeStruct((B, T, D), jnp.float32),
        jax.ShapeDtypeStruct((B, G, T, EP), jnp.float32),   # lane-dense gates
    )
    out_specs = (
        pl.BlockSpec((1, T, D), lambda b: (b, 0, 0)),
        pl.BlockSpec((1, G, T, EP), lambda b: (b, 0, 0, 0)),
    )

    out, gates_pad = pl.pallas_call(
        kernel,
        out_shape=out_shape,
        grid_spec=pltpu.PrefetchScalarGridSpec(
            num_scalar_prefetch=0,
            grid=(B,),                                      # one batch per step
            in_specs=in_specs,
            out_specs=out_specs,
        ),
        compiler_params=pltpu.CompilerParams(
            dimension_semantics=("parallel",),              # megacore-shardable
            vmem_limit_bytes=32 * 1024 * 1024,
        ),
    )(*inputs)

    gates = gates_pad[:, :, :, :E]                          # (B, G, T, E)
    return out, gates


def init_params(key, *, embed_dim, num_heads, head_dim, n_gates, n_experts, moe_dim):
    hd = num_heads * head_dim
    ks = jax.random.split(key, 8)
    s = 0.02
    wq = s * jax.random.normal(ks[0], (embed_dim, hd), jnp.float32)
    wk = s * jax.random.normal(ks[1], (embed_dim, hd), jnp.float32)
    wv = s * jax.random.normal(ks[2], (embed_dim, hd), jnp.float32)
    wo = s * jax.random.normal(ks[3], (hd, embed_dim), jnp.float32)
    bq = jnp.zeros((1, hd), jnp.float32)
    bk = jnp.zeros((1, hd), jnp.float32)
    bv = jnp.zeros((1, hd), jnp.float32)
    bo = jnp.zeros((1, embed_dim), jnp.float32)
    g1 = jnp.ones((1, embed_dim), jnp.float32)
    b1 = jnp.zeros((1, embed_dim), jnp.float32)
    g2 = jnp.ones((1, embed_dim), jnp.float32)
    b2 = jnp.zeros((1, embed_dim), jnp.float32)
    gw = s * jax.random.normal(ks[4], (n_gates, embed_dim, n_experts), jnp.float32)
    gb = jnp.zeros((n_gates, n_experts), jnp.float32)
    ew1 = s * jax.random.normal(ks[5], (n_gates, n_experts, embed_dim, moe_dim), jnp.float32)
    eb1 = jnp.zeros((n_gates, n_experts, moe_dim), jnp.float32)
    ew2 = s * jax.random.normal(ks[6], (n_gates, n_experts, moe_dim, embed_dim), jnp.float32)
    eb2 = jnp.zeros((n_gates, n_experts, embed_dim), jnp.float32)
    return (wq, bq, wk, bk, wv, bv, wo, bo, g1, b1, g2, b2,
            gw, gb, ew1, eb1, ew2, eb2)


if __name__ == "__main__":
    # EncoderBlock hyper-params (vocab_size is unused in forward).
    B = 2
    seq_len = 8
    embedding_dim = 32
    num_head = 4
    head_dim = 8
    n_experts = 4
    n_gates = 2
    moe_dim = 64
    top_k_experts = 2

    key = jax.random.PRNGKey(0)
    kx, kp = jax.random.split(key)
    x = jax.random.normal(kx, (B, seq_len, embedding_dim), jnp.float32)
    params = init_params(
        kp, embed_dim=embedding_dim, num_heads=num_head, head_dim=head_dim,
        n_gates=n_gates, n_experts=n_experts, moe_dim=moe_dim,
    )

    # one-time weight packing (NOT in the per-call path)
    packed, e_pad = pack_params(
        params, num_heads=num_head, head_dim=head_dim, n_gates=n_gates,
        n_experts=n_experts, moe_dim=moe_dim, seq_len=seq_len)
    packed = jax.block_until_ready(packed)

    normed, gates_respond = encoder_block(
        x, packed,
        num_heads=num_head, head_dim=head_dim,
        n_gates=n_gates, n_experts=n_experts, top_k=top_k_experts,
        e_pad=e_pad,
    )
    jax.block_until_ready((normed, gates_respond))

    assert normed.shape == (B, seq_len, embedding_dim)
    assert gates_respond.shape == (B, n_gates, seq_len, n_experts)
    assert bool(jnp.all(jnp.isfinite(normed)))
    assert bool(jnp.all(jnp.isfinite(gates_respond)))
    print("KERNEL_OK")
</pallas_src>

<mosaic_0001>
module attributes {stable_mosaic.version = 11 : i64} {
  func.func @encoder_block_kernel(%arg0: i32, %arg1: memref<1x8x32xf32, #tpu.memory_space<vmem>>, %arg2: memref<32x96xbf16, #tpu.memory_space<vmem>>, %arg3: memref<1x96xf32, #tpu.memory_space<vmem>>, %arg4: memref<32x32xbf16, #tpu.memory_space<vmem>>, %arg5: memref<5x32xf32, #tpu.memory_space<vmem>>, %arg6: memref<1x8x8xf32, #tpu.memory_space<vmem>>, %arg7: memref<32x256xbf16, #tpu.memory_space<vmem>>, %arg8: memref<1x256xf32, #tpu.memory_space<vmem>>, %arg9: memref<1x128xf32, #tpu.memory_space<vmem>>, %arg10: memref<128x256xf32, #tpu.memory_space<vmem>>, %arg11: memref<2x32x256xbf16, #tpu.memory_space<vmem>>, %arg12: memref<2x1x256xf32, #tpu.memory_space<vmem>>, %arg13: memref<2x256x32xbf16, #tpu.memory_space<vmem>>, %arg14: memref<2x128x32xf32, #tpu.memory_space<vmem>>, %arg15: memref<1x8x32xf32, #tpu.memory_space<vmem>>, %arg16: memref<1x2x8x128xf32, #tpu.memory_space<vmem>>) attributes {dimension_semantics = [#tpu.dimension_semantics<parallel>], iteration_bounds = array<i64: 2>, scalar_prefetch = 0 : i64, scratch_operands = 0 : i64, tpu.core_type = #tpu.core_type<tc>, window_params = [{transform_indices = @transform_0, window_bounds = array<i64: 1, 8, 32>}, {pipeline_mode = #tpu.pipeline_mode<synchronous>, transform_indices = @transform_1, window_bounds = array<i64: 32, 96>}, {pipeline_mode = #tpu.pipeline_mode<synchronous>, transform_indices = @transform_2, window_bounds = array<i64: 1, 96>}, {pipeline_mode = #tpu.pipeline_mode<synchronous>, transform_indices = @transform_3, window_bounds = array<i64: 32, 32>}, {pipeline_mode = #tpu.pipeline_mode<synchronous>, transform_indices = @transform_4, window_bounds = array<i64: 5, 32>}, {pipeline_mode = #tpu.pipeline_mode<synchronous>, transform_indices = @transform_5, window_bounds = array<i64: 1, 8, 8>}, {pipeline_mode = #tpu.pipeline_mode<synchronous>, transform_indices = @transform_6, window_bounds = array<i64: 32, 256>}, {pipeline_mode = #tpu.pipeline_mode<synchronous>, transform_indices = @transform_7, window_bounds = array<i64: 1, 256>}, {pipeline_mode = #tpu.pipeline_mode<synchronous>, transform_indices = @transform_8, window_bounds = array<i64: 1, 128>}, {pipeline_mode = #tpu.pipeline_mode<synchronous>, transform_indices = @transform_9, window_bounds = array<i64: 128, 256>}, {pipeline_mode = #tpu.pipeline_mode<synchronous>, transform_indices = @transform_10, window_bounds = array<i64: 2, 32, 256>}, {pipeline_mode = #tpu.pipeline_mode<synchronous>, transform_indices = @transform_11, window_bounds = array<i64: 2, 1, 256>}, {pipeline_mode = #tpu.pipeline_mode<synchronous>, transform_indices = @transform_12, window_bounds = array<i64: 2, 256, 32>}, {pipeline_mode = #tpu.pipeline_mode<synchronous>, transform_indices = @transform_13, window_bounds = array<i64: 2, 128, 32>}, {transform_indices = @transform_14, window_bounds = array<i64: 1, 8, 32>}, {transform_indices = @transform_15, window_bounds = array<i64: 1, 2, 8, 128>}]} {
    %c0 = arith.constant 0 : index
    %c0_0 = arith.constant 0 : index
    %c0_1 = arith.constant 0 : index
    %0 = vector.load %arg1[%c0, %c0_0, %c0_1] : memref<1x8x32xf32, #tpu.memory_space<vmem>>, vector<1x8x32xf32>
    %1 = vector.shape_cast %0 : vector<1x8x32xf32> to vector<8x32xf32>
    %2 = arith.truncf %1 : vector<8x32xf32> to vector<8x32xbf16>
    %c0_2 = arith.constant 0 : index
    %c0_3 = arith.constant 0 : index
    %3 = vector.load %arg2[%c0_2, %c0_3] : memref<32x96xbf16, #tpu.memory_space<vmem>>, vector<32x96xbf16>
    %cst = arith.constant dense<0.000000e+00> : vector<8x96xf32>
    %4 = tpu.matmul %2, %3, %cst {dimension_numbers = #tpu.dot_dimension_numbers<[1], [0], [0], [1], [0, 0, 1, 1], [], []>} : vector<8x32xbf16>, vector<32x96xbf16>, vector<8x96xf32> -> vector<8x96xf32>
    %c0_4 = arith.constant 0 : index
    %c0_5 = arith.constant 0 : index
    %5 = vector.load %arg3[%c0_4, %c0_5] : memref<1x96xf32, #tpu.memory_space<vmem>>, vector<1x96xf32>
    %6 = vector.broadcast %5 : vector<1x96xf32> to vector<8x96xf32>
    %7 = arith.addf %4, %6 : vector<8x96xf32>
    %8 = vector.extract_strided_slice %7 {offsets = [0, 0], sizes = [8, 32], strides = [1, 1]} : vector<8x96xf32> to vector<8x32xf32>
    %9 = vector.shape_cast %8 : vector<8x32xf32> to vector<8x4x8xf32>
    %10 = tpu.transpose %9, [1, 0, 2] : vector<8x4x8xf32> -> vector<4x8x8xf32>
    %11 = arith.truncf %10 : vector<4x8x8xf32> to vector<4x8x8xbf16>
    %12 = vector.extract_strided_slice %7 {offsets = [0, 32], sizes = [8, 32], strides = [1, 1]} : vector<8x96xf32> to vector<8x32xf32>
    %13 = vector.shape_cast %12 : vector<8x32xf32> to vector<8x4x8xf32>
    %14 = tpu.transpose %13, [1, 0, 2] : vector<8x4x8xf32> -> vector<4x8x8xf32>
    %15 = arith.truncf %14 : vector<4x8x8xf32> to vector<4x8x8xbf16>
    %16 = vector.extract_strided_slice %7 {offsets = [0, 64], sizes = [8, 32], strides = [1, 1]} : vector<8x96xf32> to vector<8x32xf32>
    %17 = vector.shape_cast %16 : vector<8x32xf32> to vector<8x4x8xf32>
    %18 = tpu.transpose %17, [1, 0, 2] : vector<8x4x8xf32> -> vector<4x8x8xf32>
    %19 = arith.truncf %18 : vector<4x8x8xf32> to vector<4x8x8xbf16>
    "tpu.trace_start"() <{level = 10 : i32, message = "hqd,hkd->hqk"}> : () -> ()
    %cst_6 = arith.constant dense<0.000000e+00> : vector<4x8x8xf32>
    %20 = tpu.matmul %11, %15, %cst_6 {dimension_numbers = #tpu.dot_dimension_numbers<[2], [2], [1], [1], [0, 0, 0, 1, 1, 1], [0], [0]>} : vector<4x8x8xbf16>, vector<4x8x8xbf16>, vector<4x8x8xf32> -> vector<4x8x8xf32>
    "tpu.trace_stop"() : () -> ()
    %c0_7 = arith.constant 0 : index
    %c0_8 = arith.constant 0 : index
    %c0_9 = arith.constant 0 : index
    %21 = vector.load %arg6[%c0_7, %c0_8, %c0_9] : memref<1x8x8xf32, #tpu.memory_space<vmem>>, vector<1x8x8xf32>
    %22 = vector.broadcast %21 : vector<1x8x8xf32> to vector<4x8x8xf32>
    %23 = arith.addf %20, %22 : vector<4x8x8xf32>
    %cst_10 = arith.constant dense<0xFF800000> : vector<4x8xf32>
    %24 = vector.multi_reduction <maximumf>, %23, %cst_10 [2] : vector<4x8x8xf32> to vector<4x8xf32>
    %25 = vector.shape_cast %24 : vector<4x8xf32> to vector<4x8x1xf32>
    %26 = vector.broadcast %25 : vector<4x8x1xf32> to vector<4x8x8xf32>
    %27 = arith.subf %23, %26 : vector<4x8x8xf32>
    %28 = math.exp %27 : vector<4x8x8xf32>
    %cst_11 = arith.constant dense<0.000000e+00> : vector<4x8xf32>
    %29 = vector.multi_reduction <add>, %28, %cst_11 [2] : vector<4x8x8xf32> to vector<4x8xf32>
    %30 = vector.shape_cast %29 : vector<4x8xf32> to vector<4x8x1xf32>
    %31 = tpu.reciprocal %30 {approx = true} : vector<4x8x1xf32> -> vector<4x8x1xf32>
    %32 = vector.broadcast %31 : vector<4x8x1xf32> to vector<4x8x8xf32>
    %33 = arith.mulf %28, %32 : vector<4x8x8xf32>
    %34 = arith.truncf %33 : vector<4x8x8xf32> to vector<4x8x8xbf16>
    "tpu.trace_start"() <{level = 10 : i32, message = "hqk,hkd->hqd"}> : () -> ()
    %cst_12 = arith.constant dense<0.000000e+00> : vector<4x8x8xf32>
    %35 = tpu.matmul %34, %19, %cst_12 {dimension_numbers = #tpu.dot_dimension_numbers<[2], [1], [1], [2], [0, 0, 0, 1, 1, 2], [0], [0]>} : vector<4x8x8xbf16>, vector<4x8x8xbf16>, vector<4x8x8xf32> -> vector<4x8x8xf32>
    "tpu.trace_stop"() : () -> ()
    %36 = tpu.transpose %35, [1, 0, 2] : vector<4x8x8xf32> -> vector<8x4x8xf32>
    %37 = vector.shape_cast %36 : vector<8x4x8xf32> to vector<8x32xf32>
    %c0_13 = arith.constant 0 : index
    %c0_14 = arith.constant 0 : index
    %38 = vector.load %arg5[%c0_13, %c0_14] : memref<5x32xf32, #tpu.memory_space<vmem>>, vector<1x32xf32>
    %c1 = arith.constant 1 : index
    %c0_15 = arith.constant 0 : index
    %39 = vector.load %arg5[%c1, %c0_15] : memref<5x32xf32, #tpu.memory_space<vmem>>, vector<1x32xf32>
    %c2 = arith.constant 2 : index
    %c0_16 = arith.constant 0 : index
    %40 = vector.load %arg5[%c2, %c0_16] : memref<5x32xf32, #tpu.memory_space<vmem>>, vector<1x32xf32>
    %c3 = arith.constant 3 : index
    %c0_17 = arith.constant 0 : index
    %41 = vector.load %arg5[%c3, %c0_17] : memref<5x32xf32, #tpu.memory_space<vmem>>, vector<1x32xf32>
    %c4 = arith.constant 4 : index
    %c0_18 = arith.constant 0 : index
    %42 = vector.load %arg5[%c4, %c0_18] : memref<5x32xf32, #tpu.memory_space<vmem>>, vector<1x32xf32>
    %43 = arith.truncf %37 : vector<8x32xf32> to vector<8x32xbf16>
    %c0_19 = arith.constant 0 : index
    %c0_20 = arith.constant 0 : index
    %44 = vector.load %arg4[%c0_19, %c0_20] : memref<32x32xbf16, #tpu.memory_space<vmem>>, vector<32x32xbf16>
    %cst_21 = arith.constant dense<0.000000e+00> : vector<8x32xf32>
    %45 = tpu.matmul %43, %44, %cst_21 {dimension_numbers = #tpu.dot_dimension_numbers<[1], [0], [0], [1], [0, 0, 1, 1], [], []>} : vector<8x32xbf16>, vector<32x32xbf16>, vector<8x32xf32> -> vector<8x32xf32>
    %46 = vector.broadcast %38 : vector<1x32xf32> to vector<8x32xf32>
    %47 = arith.addf %45, %46 : vector<8x32xf32>
    %48 = arith.addf %47, %1 : vector<8x32xf32>
    %cst_22 = arith.constant dense<0.000000e+00> : vector<8xf32>
    %49 = vector.multi_reduction <add>, %48, %cst_22 [1] : vector<8x32xf32> to vector<8xf32>
    %50 = vector.shape_cast %49 : vector<8xf32> to vector<8x1xf32>
    %cst_23 = arith.constant 3.200000e+01 : f32
    %51 = vector.broadcast %cst_23 : f32 to vector<8x1xf32>
    %52 = arith.divf %50, %51 : vector<8x1xf32>
    %53 = vector.broadcast %52 : vector<8x1xf32> to vector<8x32xf32>
    %54 = arith.subf %48, %53 : vector<8x32xf32>
    %55 = arith.mulf %54, %54 : vector<8x32xf32>
    %cst_24 = arith.constant dense<0.000000e+00> : vector<8xf32>
    %56 = vector.multi_reduction <add>, %55, %cst_24 [1] : vector<8x32xf32> to vector<8xf32>
    %57 = vector.shape_cast %56 : vector<8xf32> to vector<8x1xf32>
    %cst_25 = arith.constant 3.200000e+01 : f32
    %58 = vector.broadcast %cst_25 : f32 to vector<8x1xf32>
    %59 = arith.divf %57, %58 : vector<8x1xf32>
    %60 = vector.broadcast %52 : vector<8x1xf32> to vector<8x32xf32>
    %61 = arith.subf %48, %60 : vector<8x32xf32>
    %cst_26 = arith.constant 9.99999974E-6 : f32
    %62 = vector.broadcast %cst_26 : f32 to vector<8x1xf32>
    %63 = arith.addf %59, %62 : vector<8x1xf32>
    %64 = math.rsqrt %63 : vector<8x1xf32>
    %65 = vector.broadcast %64 : vector<8x1xf32> to vector<8x32xf32>
    %66 = arith.mulf %61, %65 : vector<8x32xf32>
    %67 = vector.broadcast %39 : vector<1x32xf32> to vector<8x32xf32>
    %68 = arith.mulf %66, %67 : vector<8x32xf32>
    %69 = vector.broadcast %40 : vector<1x32xf32> to vector<8x32xf32>
    %70 = arith.addf %68, %69 : vector<8x32xf32>
    %71 = arith.truncf %70 : vector<8x32xf32> to vector<8x32xbf16>
    %c0_27 = arith.constant 0 : index
    %c0_28 = arith.constant 0 : index
    %72 = vector.load %arg7[%c0_27, %c0_28] : memref<32x256xbf16, #tpu.memory_space<vmem>>, vector<32x256xbf16>
    %cst_29 = arith.constant dense<0.000000e+00> : vector<8x256xf32>
    %73 = tpu.matmul %71, %72, %cst_29 {dimension_numbers = #tpu.dot_dimension_numbers<[1], [0], [0], [1], [0, 0, 1, 1], [], []>} : vector<8x32xbf16>, vector<32x256xbf16>, vector<8x256xf32> -> vector<8x256xf32>
    %c0_30 = arith.constant 0 : index
    %c0_31 = arith.constant 0 : index
    %74 = vector.load %arg8[%c0_30, %c0_31] : memref<1x256xf32, #tpu.memory_space<vmem>>, vector<1x256xf32>
    %75 = vector.broadcast %74 : vector<1x256xf32> to vector<8x256xf32>
    %76 = arith.addf %73, %75 : vector<8x256xf32>
    %c0_32 = arith.constant 0 : index
    %c0_33 = arith.constant 0 : index
    %77 = vector.load %arg9[%c0_32, %c0_33] : memref<1x128xf32, #tpu.memory_space<vmem>>, vector<1x128xf32>
    %c0_34 = arith.constant 0 : index
    %c0_35 = arith.constant 0 : index
    %78 = vector.load %arg10[%c0_34, %c0_35] : memref<128x256xf32, #tpu.memory_space<vmem>>, vector<128x256xf32>
    %cst_36 = arith.constant 0.000000e+00 : f32
    %79 = vector.broadcast %cst_36 : f32 to vector<8x32xf32>
    %80 = vector.extract_strided_slice %76 {offsets = [0, 0], sizes = [8, 128], strides = [1, 1]} : vector<8x256xf32> to vector<8x128xf32>
    %cst_37 = arith.constant dense<0xFF800000> : vector<8xf32>
    %81 = vector.multi_reduction <maximumf>, %80, %cst_37 [1] : vector<8x128xf32> to vector<8xf32>
    %82 = vector.shape_cast %81 : vector<8xf32> to vector<8x1xf32>
    %83 = vector.broadcast %82 : vector<8x1xf32> to vector<8x128xf32>
    %84 = arith.subf %80, %83 : vector<8x128xf32>
    %85 = math.exp %84 : vector<8x128xf32>
    %cst_38 = arith.constant dense<0.000000e+00> : vector<8xf32>
    %86 = vector.multi_reduction <add>, %85, %cst_38 [1] : vector<8x128xf32> to vector<8xf32>
    %87 = vector.shape_cast %86 : vector<8xf32> to vector<8x1xf32>
    %88 = vector.broadcast %87 : vector<8x1xf32> to vector<8x128xf32>
    %89 = arith.divf %85, %88 : vector<8x128xf32>
    %c0_39 = arith.constant 0 : index
    %c0_40 = arith.constant 0 : index
    %c0_41 = arith.constant 0 : index
    %c0_42 = arith.constant 0 : index
    %90 = vector.load %arg16[%c0_39, %c0_40, %c0_41, %c0_42] : memref<1x2x8x128xf32, #tpu.memory_space<vmem>>, vector<1x1x8x128xf32>
    %91 = vector.shape_cast %90 : vector<1x1x8x128xf32> to vector<8x128xf32>
    %92 = vector.shape_cast %89 : vector<8x128xf32> to vector<1x1x8x128xf32>
    tpu.vector_store %arg16[%c0_39, %c0_40, %c0_41, %c0_42], %92 {strides = array<i32>} : memref<1x2x8x128xf32, #tpu.memory_space<vmem>>, vector<1x1x8x128xf32>,
    %cst_43 = arith.constant 0.000000e+00 : f32
    %93 = vector.broadcast %cst_43 : f32 to vector<8x128xf32>
    %cst_44 = arith.constant dense<0xFF800000> : vector<8xf32>
    %94 = vector.multi_reduction <maximumf>, %89, %cst_44 [1] : vector<8x128xf32> to vector<8xf32>
    %95 = vector.shape_cast %94 : vector<8xf32> to vector<8x1xf32>
    %96 = vector.broadcast %95 : vector<8x1xf32> to vector<8x128xf32>
    %97 = arith.cmpf oeq, %89, %96 : vector<8x128xf32>
    %cst_45 = arith.constant 1.280000e+02 : f32
    %98 = vector.shape_cast %77 : vector<1x128xf32> to vector<1x128xf32>
    %99 = vector.broadcast %98 : vector<1x128xf32> to vector<8x128xf32>
    %100 = vector.broadcast %cst_45 : f32 to vector<8x128xf32>
    %101 = arith.select %97, %99, %100 : vector<8x128xi1>, vector<8x128xf32>
    %cst_46 = arith.constant dense<0x7F800000> : vector<8xf32>
    %102 = vector.multi_reduction <minimumf>, %101, %cst_46 [1] : vector<8x128xf32> to vector<8xf32>
    %103 = vector.shape_cast %102 : vector<8xf32> to vector<8x1xf32>
    %104 = vector.broadcast %77 : vector<1x128xf32> to vector<8x128xf32>
    %105 = vector.broadcast %103 : vector<8x1xf32> to vector<8x128xf32>
    %106 = arith.cmpf oeq, %104, %105 : vector<8x128xf32>
    %107 = arith.extui %106 : vector<8x128xi1> to vector<8x128xi32>
    %108 = arith.sitofp %107 : vector<8x128xi32> to vector<8x128xf32>
    %109 = arith.maximumf %93, %108 : vector<8x128xf32>
    %cst_47 = arith.constant 0.000000e+00 : f32
    %110 = vector.broadcast %cst_47 : f32 to vector<8x128xf32>
    %111 = arith.cmpf ogt, %108, %110 : vector<8x128xf32>
    %cst_48 = arith.constant -1.000000e+00 : f32
    %112 = vector.broadcast %cst_48 : f32 to vector<8x128xf32>
    %113 = arith.select %111, %112, %89 : vector<8x128xi1>, vector<8x128xf32>
    %cst_49 = arith.constant dense<0xFF800000> : vector<8xf32>
    %114 = vector.multi_reduction <maximumf>, %113, %cst_49 [1] : vector<8x128xf32> to vector<8xf32>
    %115 = vector.shape_cast %114 : vector<8xf32> to vector<8x1xf32>
    %116 = vector.broadcast %115 : vector<8x1xf32> to vector<8x128xf32>
    %117 = arith.cmpf oeq, %113, %116 : vector<8x128xf32>
    %cst_50 = arith.constant 1.280000e+02 : f32
    %118 = vector.shape_cast %77 : vector<1x128xf32> to vector<1x128xf32>
    %119 = vector.broadcast %118 : vector<1x128xf32> to vector<8x128xf32>
    %120 = vector.broadcast %cst_50 : f32 to vector<8x128xf32>
    %121 = arith.select %117, %119, %120 : vector<8x128xi1>, vector<8x128xf32>
    %cst_51 = arith.constant dense<0x7F800000> : vector<8xf32>
    %122 = vector.multi_reduction <minimumf>, %121, %cst_51 [1] : vector<8x128xf32> to vector<8xf32>
    %123 = vector.shape_cast %122 : vector<8xf32> to vector<8x1xf32>
    %124 = vector.broadcast %77 : vector<1x128xf32> to vector<8x128xf32>
    %125 = vector.broadcast %123 : vector<8x1xf32> to vector<8x128xf32>
    %126 = arith.cmpf oeq, %124, %125 : vector<8x128xf32>
    %127 = arith.extui %126 : vector<8x128xi1> to vector<8x128xi32>
    %128 = arith.sitofp %127 : vector<8x128xi32> to vector<8x128xf32>
    %129 = arith.maximumf %109, %128 : vector<8x128xf32>
    %130 = arith.mulf %89, %129 : vector<8x128xf32>
    %cst_52 = arith.constant dense<0.000000e+00> : vector<8xf32>
    %131 = vector.multi_reduction <add>, %130, %cst_52 [1] : vector<8x128xf32> to vector<8xf32>
    %132 = vector.shape_cast %131 : vector<8xf32> to vector<8x1xf32>
    %133 = vector.broadcast %132 : vector<8x1xf32> to vector<8x128xf32>
    %134 = arith.divf %130, %133 : vector<8x128xf32>
    %cst_53 = arith.constant 5.000000e-01 : f32
    %135 = vector.broadcast %cst_53 : f32 to vector<8x128xf32>
    %136 = arith.mulf %134, %135 : vector<8x128xf32>
    %c0_54 = arith.constant 0 : index
    %c0_55 = arith.constant 0 : index
    %c0_56 = arith.constant 0 : index
    %137 = vector.load %arg11[%c0_54, %c0_55, %c0_56] : memref<2x32x256xbf16, #tpu.memory_space<vmem>>, vector<1x32x256xbf16>
    %138 = vector.shape_cast %137 : vector<1x32x256xbf16> to vector<32x256xbf16>
    %cst_57 = arith.constant dense<0.000000e+00> : vector<8x256xf32>
    %139 = tpu.matmul %71, %138, %cst_57 {dimension_numbers = #tpu.dot_dimension_numbers<[1], [0], [0], [1], [0, 0, 1, 1], [], []>} : vector<8x32xbf16>, vector<32x256xbf16>, vector<8x256xf32> -> vector<8x256xf32>
    %c0_58 = arith.constant 0 : index
    %c0_59 = arith.constant 0 : index
    %c0_60 = arith.constant 0 : index
    %140 = vector.load %arg12[%c0_58, %c0_59, %c0_60] : memref<2x1x256xf32, #tpu.memory_space<vmem>>, vector<1x1x256xf32>
    %141 = vector.shape_cast %140 : vector<1x1x256xf32> to vector<1x256xf32>
    %142 = vector.broadcast %141 : vector<1x256xf32> to vector<8x256xf32>
    %143 = arith.addf %139, %142 : vector<8x256xf32>
    %cst_61 = arith.constant 0.000000e+00 : f32
    %144 = vector.broadcast %cst_61 : f32 to vector<8x256xf32>
    %145 = arith.maximumf %143, %144 : vector<8x256xf32>
    %cst_62 = arith.constant dense<0.000000e+00> : vector<8x256xf32>
    %146 = tpu.matmul %136, %78, %cst_62 {dimension_numbers = #tpu.dot_dimension_numbers<[1], [0], [0], [1], [0, 0, 1, 1], [], []>} : vector<8x128xf32>, vector<128x256xf32>, vector<8x256xf32> -> vector<8x256xf32>
    %147 = arith.mulf %145, %146 : vector<8x256xf32>
    %148 = arith.truncf %147 : vector<8x256xf32> to vector<8x256xbf16>
    %c0_63 = arith.constant 0 : index
    %c0_64 = arith.constant 0 : index
    %c0_65 = arith.constant 0 : index
    %149 = vector.load %arg13[%c0_63, %c0_64, %c0_65] : memref<2x256x32xbf16, #tpu.memory_space<vmem>>, vector<1x256x32xbf16>
    %150 = vector.shape_cast %149 : vector<1x256x32xbf16> to vector<256x32xbf16>
    %cst_66 = arith.constant dense<0.000000e+00> : vector<8x32xf32>
    %151 = tpu.matmul %148, %150, %cst_66 {dimension_numbers = #tpu.dot_dimension_numbers<[1], [0], [0], [1], [0, 0, 1, 1], [], []>} : vector<8x256xbf16>, vector<256x32xbf16>, vector<8x32xf32> -> vector<8x32xf32>
    %c0_67 = arith.constant 0 : index
    %c0_68 = arith.constant 0 : index
    %c0_69 = arith.constant 0 : index
    %152 = vector.load %arg14[%c0_67, %c0_68, %c0_69] : memref<2x128x32xf32, #tpu.memory_space<vmem>>, vector<1x128x32xf32>
    %153 = vector.shape_cast %152 : vector<1x128x32xf32> to vector<128x32xf32>
    %cst_70 = arith.constant dense<0.000000e+00> : vector<8x32xf32>
    %154 = tpu.matmul %136, %153, %cst_70 {dimension_numbers = #tpu.dot_dimension_numbers<[1], [0], [0], [1], [0, 0, 1, 1], [], []>} : vector<8x128xf32>, vector<128x32xf32>, vector<8x32xf32> -> vector<8x32xf32>
    %155 = arith.addf %151, %154 : vector<8x32xf32>
    %156 = arith.addf %79, %155 : vector<8x32xf32>
    %157 = vector.extract_strided_slice %76 {offsets = [0, 128], sizes = [8, 128], strides = [1, 1]} : vector<8x256xf32> to vector<8x128xf32>
    %cst_71 = arith.constant dense<0xFF800000> : vector<8xf32>
    %158 = vector.multi_reduction <maximumf>, %157, %cst_71 [1] : vector<8x128xf32> to vector<8xf32>
    %159 = vector.shape_cast %158 : vector<8xf32> to vector<8x1xf32>
    %160 = vector.broadcast %159 : vector<8x1xf32> to vector<8x128xf32>
    %161 = arith.subf %157, %160 : vector<8x128xf32>
    %162 = math.exp %161 : vector<8x128xf32>
    %cst_72 = arith.constant dense<0.000000e+00> : vector<8xf32>
    %163 = vector.multi_reduction <add>, %162, %cst_72 [1] : vector<8x128xf32> to vector<8xf32>
    %164 = vector.shape_cast %163 : vector<8xf32> to vector<8x1xf32>
    %165 = vector.broadcast %164 : vector<8x1xf32> to vector<8x128xf32>
    %166 = arith.divf %162, %165 : vector<8x128xf32>
    %c0_73 = arith.constant 0 : index
    %c1_74 = arith.constant 1 : index
    %c0_75 = arith.constant 0 : index
    %c0_76 = arith.constant 0 : index
    %167 = vector.load %arg16[%c0_73, %c1_74, %c0_75, %c0_76] : memref<1x2x8x128xf32, #tpu.memory_space<vmem>>, vector<1x1x8x128xf32>
    %168 = vector.shape_cast %167 : vector<1x1x8x128xf32> to vector<8x128xf32>
    %169 = vector.shape_cast %166 : vector<8x128xf32> to vector<1x1x8x128xf32>
    tpu.vector_store %arg16[%c0_73, %c1_74, %c0_75, %c0_76], %169 {strides = array<i32>} : memref<1x2x8x128xf32, #tpu.memory_space<vmem>>, vector<1x1x8x128xf32>,
    %cst_77 = arith.constant 0.000000e+00 : f32
    %170 = vector.broadcast %cst_77 : f32 to vector<8x128xf32>
    %cst_78 = arith.constant dense<0xFF800000> : vector<8xf32>
    %171 = vector.multi_reduction <maximumf>, %166, %cst_78 [1] : vector<8x128xf32> to vector<8xf32>
    %172 = vector.shape_cast %171 : vector<8xf32> to vector<8x1xf32>
    %173 = vector.broadcast %172 : vector<8x1xf32> to vector<8x128xf32>
    %174 = arith.cmpf oeq, %166, %173 : vector<8x128xf32>
    %cst_79 = arith.constant 1.280000e+02 : f32
    %175 = vector.shape_cast %77 : vector<1x128xf32> to vector<1x128xf32>
    %176 = vector.broadcast %175 : vector<1x128xf32> to vector<8x128xf32>
    %177 = vector.broadcast %cst_79 : f32 to vector<8x128xf32>
    %178 = arith.select %174, %176, %177 : vector<8x128xi1>, vector<8x128xf32>
    %cst_80 = arith.constant dense<0x7F800000> : vector<8xf32>
    %179 = vector.multi_reduction <minimumf>, %178, %cst_80 [1] : vector<8x128xf32> to vector<8xf32>
    %180 = vector.shape_cast %179 : vector<8xf32> to vector<8x1xf32>
    %181 = vector.broadcast %77 : vector<1x128xf32> to vector<8x128xf32>
    %182 = vector.broadcast %180 : vector<8x1xf32> to vector<8x128xf32>
    %183 = arith.cmpf oeq, %181, %182 : vector<8x128xf32>
    %184 = arith.extui %183 : vector<8x128xi1> to vector<8x128xi32>
    %185 = arith.sitofp %184 : vector<8x128xi32> to vector<8x128xf32>
    %186 = arith.maximumf %170, %185 : vector<8x128xf32>
    %cst_81 = arith.constant 0.000000e+00 : f32
    %187 = vector.broadcast %cst_81 : f32 to vector<8x128xf32>
    %188 = arith.cmpf ogt, %185, %187 : vector<8x128xf32>
    %cst_82 = arith.constant -1.000000e+00 : f32
    %189 = vector.broadcast %cst_82 : f32 to vector<8x128xf32>
    %190 = arith.select %188, %189, %166 : vector<8x128xi1>, vector<8x128xf32>
    %cst_83 = arith.constant dense<0xFF800000> : vector<8xf32>
    %191 = vector.multi_reduction <maximumf>, %190, %cst_83 [1] : vector<8x128xf32> to vector<8xf32>
    %192 = vector.shape_cast %191 : vector<8xf32> to vector<8x1xf32>
    %193 = vector.broadcast %192 : vector<8x1xf32> to vector<8x128xf32>
    %194 = arith.cmpf oeq, %190, %193 : vector<8x128xf32>
    %cst_84 = arith.constant 1.280000e+02 : f32
    %195 = vector.shape_cast %77 : vector<1x128xf32> to vector<1x128xf32>
    %196 = vector.broadcast %195 : vector<1x128xf32> to vector<8x128xf32>
    %197 = vector.broadcast %cst_84 : f32 to vector<8x128xf32>
    %198 = arith.select %194, %196, %197 : vector<8x128xi1>, vector<8x128xf32>
    %cst_85 = arith.constant dense<0x7F800000> : vector<8xf32>
    %199 = vector.multi_reduction <minimumf>, %198, %cst_85 [1] : vector<8x128xf32> to vector<8xf32>
    %200 = vector.shape_cast %199 : vector<8xf32> to vector<8x1xf32>
    %201 = vector.broadcast %77 : vector<1x128xf32> to vector<8x128xf32>
    %202 = vector.broadcast %200 : vector<8x1xf32> to vector<8x128xf32>
    %203 = arith.cmpf oeq, %201, %202 : vector<8x128xf32>
    %204 = arith.extui %203 : vector<8x128xi1> to vector<8x128xi32>
    %205 = arith.sitofp %204 : vector<8x128xi32> to vector<8x128xf32>
    %206 = arith.maximumf %186, %205 : vector<8x128xf32>
    %207 = arith.mulf %166, %206 : vector<8x128xf32>
    %cst_86 = arith.constant dense<0.000000e+00> : vector<8xf32>
    %208 = vector.multi_reduction <add>, %207, %cst_86 [1] : vector<8x128xf32> to vector<8xf32>
    %209 = vector.shape_cast %208 : vector<8xf32> to vector<8x1xf32>
    %210 = vector.broadcast %209 : vector<8x1xf32> to vector<8x128xf32>
    %211 = arith.divf %207, %210 : vector<8x128xf32>
    %cst_87 = arith.constant 5.000000e-01 : f32
    %212 = vector.broadcast %cst_87 : f32 to vector<8x128xf32>
    %213 = arith.mulf %211, %212 : vector<8x128xf32>
    %c1_88 = arith.constant 1 : index
    %c0_89 = arith.constant 0 : index
    %c0_90 = arith.constant 0 : index
    %214 = vector.load %arg11[%c1_88, %c0_89, %c0_90] : memref<2x32x256xbf16, #tpu.memory_space<vmem>>, vector<1x32x256xbf16>
    %215 = vector.shape_cast %214 : vector<1x32x256xbf16> to vector<32x256xbf16>
    %cst_91 = arith.constant dense<0.000000e+00> : vector<8x256xf32>
    %216 = tpu.matmul %71, %215, %cst_91 {dimension_numbers = #tpu.dot_dimension_numbers<[1], [0], [0], [1], [0, 0, 1, 1], [], []>} : vector<8x32xbf16>, vector<32x256xbf16>, vector<8x256xf32> -> vector<8x256xf32>
    %c1_92 = arith.constant 1 : index
    %c0_93 = arith.constant 0 : index
    %c0_94 = arith.constant 0 : index
    %217 = vector.load %arg12[%c1_92, %c0_93, %c0_94] : memref<2x1x256xf32, #tpu.memory_space<vmem>>, vector<1x1x256xf32>
    %218 = vector.shape_cast %217 : vector<1x1x256xf32> to vector<1x256xf32>
    %219 = vector.broadcast %218 : vector<1x256xf32> to vector<8x256xf32>
    %220 = arith.addf %216, %219 : vector<8x256xf32>
    %cst_95 = arith.constant 0.000000e+00 : f32
    %221 = vector.broadcast %cst_95 : f32 to vector<8x256xf32>
    %222 = arith.maximumf %220, %221 : vector<8x256xf32>
    %cst_96 = arith.constant dense<0.000000e+00> : vector<8x256xf32>
    %223 = tpu.matmul %213, %78, %cst_96 {dimension_numbers = #tpu.dot_dimension_numbers<[1], [0], [0], [1], [0, 0, 1, 1], [], []>} : vector<8x128xf32>, vector<128x256xf32>, vector<8x256xf32> -> vector<8x256xf32>
    %224 = arith.mulf %222, %223 : vector<8x256xf32>
    %225 = arith.truncf %224 : vector<8x256xf32> to vector<8x256xbf16>
    %c1_97 = arith.constant 1 : index
    %c0_98 = arith.constant 0 : index
    %c0_99 = arith.constant 0 : index
    %226 = vector.load %arg13[%c1_97, %c0_98, %c0_99] : memref<2x256x32xbf16, #tpu.memory_space<vmem>>, vector<1x256x32xbf16>
    %227 = vector.shape_cast %226 : vector<1x256x32xbf16> to vector<256x32xbf16>
    %cst_100 = arith.constant dense<0.000000e+00> : vector<8x32xf32>
    %228 = tpu.matmul %225, %227, %cst_100 {dimension_numbers = #tpu.dot_dimension_numbers<[1], [0], [0], [1], [0, 0, 1, 1], [], []>} : vector<8x256xbf16>, vector<256x32xbf16>, vector<8x32xf32> -> vector<8x32xf32>
    %c1_101 = arith.constant 1 : index
    %c0_102 = arith.constant 0 : index
    %c0_103 = arith.constant 0 : index
    %229 = vector.load %arg14[%c1_101, %c0_102, %c0_103] : memref<2x128x32xf32, #tpu.memory_space<vmem>>, vector<1x128x32xf32>
    %230 = vector.shape_cast %229 : vector<1x128x32xf32> to vector<128x32xf32>
    %cst_104 = arith.constant dense<0.000000e+00> : vector<8x32xf32>
    %231 = tpu.matmul %213, %230, %cst_104 {dimension_numbers = #tpu.dot_dimension_numbers<[1], [0], [0], [1], [0, 0, 1, 1], [], []>} : vector<8x128xf32>, vector<128x32xf32>, vector<8x32xf32> -> vector<8x32xf32>
    %232 = arith.addf %228, %231 : vector<8x32xf32>
    %233 = arith.addf %156, %232 : vector<8x32xf32>
    %234 = arith.addf %233, %70 : vector<8x32xf32>
    %cst_105 = arith.constant dense<0.000000e+00> : vector<8xf32>
    %235 = vector.multi_reduction <add>, %234, %cst_105 [1] : vector<8x32xf32> to vector<8xf32>
    %236 = vector.shape_cast %235 : vector<8xf32> to vector<8x1xf32>
    %cst_106 = arith.constant 3.200000e+01 : f32
    %237 = vector.broadcast %cst_106 : f32 to vector<8x1xf32>
    %238 = arith.divf %236, %237 : vector<8x1xf32>
    %239 = vector.broadcast %238 : vector<8x1xf32> to vector<8x32xf32>
    %240 = arith.subf %234, %239 : vector<8x32xf32>
    %241 = arith.mulf %240, %240 : vector<8x32xf32>
    %cst_107 = arith.constant dense<0.000000e+00> : vector<8xf32>
    %242 = vector.multi_reduction <add>, %241, %cst_107 [1] : vector<8x32xf32> to vector<8xf32>
    %243 = vector.shape_cast %242 : vector<8xf32> to vector<8x1xf32>
    %cst_108 = arith.constant 3.200000e+01 : f32
    %244 = vector.broadcast %cst_108 : f32 to vector<8x1xf32>
    %245 = arith.divf %243, %244 : vector<8x1xf32>
    %246 = vector.broadcast %238 : vector<8x1xf32> to vector<8x32xf32>
    %247 = arith.subf %234, %246 : vector<8x32xf32>
    %cst_109 = arith.constant 9.99999974E-6 : f32
    %248 = vector.broadcast %cst_109 : f32 to vector<8x1xf32>
    %249 = arith.addf %245, %248 : vector<8x1xf32>
    %250 = math.rsqrt %249 : vector<8x1xf32>
    %251 = vector.broadcast %250 : vector<8x1xf32> to vector<8x32xf32>
    %252 = arith.mulf %247, %251 : vector<8x32xf32>
    %253 = vector.broadcast %41 : vector<1x32xf32> to vector<8x32xf32>
    %254 = arith.mulf %252, %253 : vector<8x32xf32>
    %255 = vector.broadcast %42 : vector<1x32xf32> to vector<8x32xf32>
    %256 = arith.addf %254, %255 : vector<8x32xf32>
    %c0_110 = arith.constant 0 : index
    %c0_111 = arith.constant 0 : index
    %c0_112 = arith.constant 0 : index
    %257 = vector.load %arg15[%c0_110, %c0_111, %c0_112] : memref<1x8x32xf32, #tpu.memory_space<vmem>>, vector<1x8x32xf32>
    %258 = vector.shape_cast %257 : vector<1x8x32xf32> to vector<8x32xf32>
    %259 = vector.shape_cast %256 : vector<8x32xf32> to vector<1x8x32xf32>
    tpu.vector_store %arg15[%c0_110, %c0_111, %c0_112], %259 {strides = array<i32>} : memref<1x8x32xf32, #tpu.memory_space<vmem>>, vector<1x8x32xf32>,
    return
  }
  func.func @transform_0(%arg0: i32) -> (i32, i32, i32) {
    %c0_i32 = arith.constant 0 : i32
    %c0_i32_0 = arith.constant 0 : i32
    %c0_i32_1 = arith.constant 0 : i32
    return %arg0, %c0_i32, %c0_i32_0 : i32, i32, i32
  }
  func.func @transform_1(%arg0: i32) -> (i32, i32) {
    %c0_i32 = arith.constant 0 : i32
    %c0_i32_0 = arith.constant 0 : i32
    %c0_i32_1 = arith.constant 0 : i32
    return %c0_i32, %c0_i32_0 : i32, i32
  }
  func.func @transform_2(%arg0: i32) -> (i32, i32) {
    %c0_i32 = arith.constant 0 : i32
    %c0_i32_0 = arith.constant 0 : i32
    %c0_i32_1 = arith.constant 0 : i32
    return %c0_i32, %c0_i32_0 : i32, i32
  }
  func.func @transform_3(%arg0: i32) -> (i32, i32) {
    %c0_i32 = arith.constant 0 : i32
    %c0_i32_0 = arith.constant 0 : i32
    %c0_i32_1 = arith.constant 0 : i32
    return %c0_i32, %c0_i32_0 : i32, i32
  }
  func.func @transform_4(%arg0: i32) -> (i32, i32) {
    %c0_i32 = arith.constant 0 : i32
    %c0_i32_0 = arith.constant 0 : i32
    %c0_i32_1 = arith.constant 0 : i32
    return %c0_i32, %c0_i32_0 : i32, i32
  }
  func.func @transform_5(%arg0: i32) -> (i32, i32, i32) {
    %c0_i32 = arith.constant 0 : i32
    %c0_i32_0 = arith.constant 0 : i32
    %c0_i32_1 = arith.constant 0 : i32
    %c0_i32_2 = arith.constant 0 : i32
    return %c0_i32, %c0_i32_0, %c0_i32_1 : i32, i32, i32
  }
  func.func @transform_6(%arg0: i32) -> (i32, i32) {
    %c0_i32 = arith.constant 0 : i32
    %c0_i32_0 = arith.constant 0 : i32
    %c0_i32_1 = arith.constant 0 : i32
    return %c0_i32, %c0_i32_0 : i32, i32
  }
  func.func @transform_7(%arg0: i32) -> (i32, i32) {
    %c0_i32 = arith.constant 0 : i32
    %c0_i32_0 = arith.constant 0 : i32
    %c0_i32_1 = arith.constant 0 : i32
    return %c0_i32, %c0_i32_0 : i32, i32
  }
  func.func @transform_8(%arg0: i32) -> (i32, i32) {
    %c0_i32 = arith.constant 0 : i32
    %c0_i32_0 = arith.constant 0 : i32
    %c0_i32_1 = arith.constant 0 : i32
    return %c0_i32, %c0_i32_0 : i32, i32
  }
  func.func @transform_9(%arg0: i32) -> (i32, i32) {
    %c0_i32 = arith.constant 0 : i32
    %c0_i32_0 = arith.constant 0 : i32
    %c0_i32_1 = arith.constant 0 : i32
    return %c0_i32, %c0_i32_0 : i32, i32
  }
  func.func @transform_10(%arg0: i32) -> (i32, i32, i32) {
    %c0_i32 = arith.constant 0 : i32
    %c0_i32_0 = arith.constant 0 : i32
    %c0_i32_1 = arith.constant 0 : i32
    %c0_i32_2 = arith.constant 0 : i32
    return %c0_i32, %c0_i32_0, %c0_i32_1 : i32, i32, i32
  }
  func.func @transform_11(%arg0: i32) -> (i32, i32, i32) {
    %c0_i32 = arith.constant 0 : i32
    %c0_i32_0 = arith.constant 0 : i32
    %c0_i32_1 = arith.constant 0 : i32
    %c0_i32_2 = arith.constant 0 : i32
    return %c0_i32, %c0_i32_0, %c0_i32_1 : i32, i32, i32
  }
  func.func @transform_12(%arg0: i32) -> (i32, i32, i32) {
    %c0_i32 = arith.constant 0 : i32
    %c0_i32_0 = arith.constant 0 : i32
    %c0_i32_1 = arith.constant 0 : i32
    %c0_i32_2 = arith.constant 0 : i32
    return %c0_i32, %c0_i32_0, %c0_i32_1 : i32, i32, i32
  }
  func.func @transform_13(%arg0: i32) -> (i32, i32, i32) {
    %c0_i32 = arith.constant 0 : i32
    %c0_i32_0 = arith.constant 0 : i32
    %c0_i32_1 = arith.constant 0 : i32
    %c0_i32_2 = arith.constant 0 : i32
    return %c0_i32, %c0_i32_0, %c0_i32_1 : i32, i32, i32
  }
  func.func @transform_14(%arg0: i32) -> (i32, i32, i32) {
    %c0_i32 = arith.constant 0 : i32
    %c0_i32_0 = arith.constant 0 : i32
    %c0_i32_1 = arith.constant 0 : i32
    return %arg0, %c0_i32, %c0_i32_0 : i32, i32, i32
  }
  func.func @transform_15(%arg0: i32) -> (i32, i32, i32, i32) {
    %c0_i32 = arith.constant 0 : i32
    %c0_i32_0 = arith.constant 0 : i32
    %c0_i32_1 = arith.constant 0 : i32
    %c0_i32_2 = arith.constant 0 : i32
    return %arg0, %c0_i32, %c0_i32_0, %c0_i32_1 : i32, i32, i32, i32
  }
}

</mosaic_0001>

<bundles_post_ra>
// kernel: tpu_custom_call.1
= control target key start
LH: loop header
LB: loop body
LE: loop exit
PB: predicated region body
PF: predicated region fallthrough
CT: control target
= control target key end

     0   :  { %s3877_s0 = inlined_call_operand.vmem [shape: f32[2,8,32], index: 0, kind: input, shape index: {}]   ;;  %s3878_s1 = inlined_call_operand.vmem [shape: bf16[32,96], index: 1, kind: input, shape index: {}]   ;;  %s3879_s2 = inlined_call_operand.vmem [shape: f32[1,96], index: 2, kind: input, shape index: {}]   ;;  %s3880_s3 = inlined_call_operand.vmem [shape: bf16[32,32], index: 3, kind: input, shape index: {}]   ;;  %s3881_s4 = inlined_call_operand.vmem [shape: f32[5,32], index: 4, kind: input, shape index: {}]   ;;  %s3882_s5 = inlined_call_operand.vmem [shape: f32[1,8,8], index: 5, kind: input, shape index: {}]   ;;  %s3883_s6 = inlined_call_operand.vmem [shape: bf16[32,256], index: 6, kind: input, shape index: {}]   ;;  %s3884_s7 = inlined_call_operand.vmem [shape: f32[1,256], index: 7, kind: input, shape index: {}]   ;;  %s3885_s8 = inlined_call_operand.vmem [shape: f32[1,128], index: 8, kind: input, shape index: {}]   ;;  %s3886_s9 = inlined_call_operand.vmem [shape: f32[128,256], index: 9, kind: input, shape index: {}]   ;;  %s3887_s10 = inlined_call_operand.vmem [shape: bf16[2,32,256], index: 10, kind: input, shape index: {}]   ;;  %s3888_s11 = inlined_call_operand.vmem [shape: f32[2,1,256], index: 11, kind: input, shape index: {}]   ;;  %s3889_s12 = inlined_call_operand.vmem [shape: bf16[2,256,32], index: 12, kind: input, shape index: {}]   ;;  %s3890_s13 = inlined_call_operand.vmem [shape: f32[2,128,32], index: 13, kind: input, shape index: {}]   ;;  %s3891_s14 = inlined_call_operand.hbm [shape: f32[2,8,32], index: 14, kind: output, shape index: {0}]   ;;  %s3892_s15 = inlined_call_operand.hbm [shape: f32[2,2,8,128], index: 15, kind: output, shape index: {1}]  }
   0x1   :  { %3897 = sst [smem:[#allocation11_spill]] %s3877_s0 }
   0x2   :  { %3898 = sst [smem:[#allocation12_spill]] %s3878_s1 }
   0x3   :  { %3899 = sst [smem:[#allocation13_spill]] %s3879_s2 }
   0x4   :  { %3900 = sst [smem:[#allocation14_spill]] %s3880_s3 }
   0x5   :  { %3901 = sst [smem:[#allocation15_spill]] %s3882_s5 }
   0x6   :  { %3902 = sst [smem:[#allocation16_spill]] %s3883_s6 }
   0x7   :  { %3903 = sst [smem:[#allocation17_spill]] %s3884_s7 }
   0x8   :  { %21 = vsyncpa [#allocation3], 0 }
   0x9   :  { %23 = vsyncpa [#allocation3 + $0x1], 0 }
   0xa   :  { %24 = vsyncpa [#allocation5], 0 }
   0xb   :  { %26 = vsyncpa [#allocation5 + $0x1], 0  ;;  %s2930_s18 = smov 0   ;;  %s2932_s19 = smov 0  }
   0xc   :  { %s2934_s20 = smov 0   ;;  %s2936_s21 = smov 0  }
   0xd LB: > { %3904 = sst [smem:[#allocation8_spill]] %s2831_s20  ;;  %s2951_s22 = sadd.s32 4294967295, %s2835_s21   ;;  %s2835_s21 = sphi %s2936_s21, %s3917_s21   ;;  %s2831_s20 = sphi %s2934_s20, %s3919_s20   ;;  %s2827_s19 = sphi %s2932_s19, %s3921_s19   ;;  %s2823_s18 = sphi %s2930_s18, %s3920_s18  }
   0xe   : > { %s2294_s23 = sadd.s32 4294967294, %s2835_s21   ;;  %s2955_s24 = sadd.s32 1, %s2835_s21  }
   0xf   : > { %3905 = sst [smem:[#allocation9_spill]] %s2955_s24  ;;  %s338_s25 = sadd.s32 1, %s2831_s20 }
  0x10   : > { %s335_s26 = ssub.s32 %s2835_s21, %s2955_s24  ;;  %p348_p0 = scmp.ne.s32.totalorder %s2831_s20, %s2827_s19 }
  0x11   : > { %p336_p1 = scmp.eq.s32.totalorder %s335_s26, 0  ;;  %p349_p2 = scmp.eq.s32.totalorder %s2951_s22, 1 }
  0x12   : > { %p354_p3 = scmp.ne.s32.totalorder %s2827_s19, %s2823_s18  ;;  %p355_p4 = scmp.eq.s32.totalorder %s2294_s23, 1 }
  0x13   : > { %s2966_s27 = scalar_select %p336_p1, %s2831_s20, %s338_s25  }
  0x14   : > { %p2968_p5 = por %p349_p2, %p348_p0  ;;  %p2972_p6 = por %p355_p4, %p354_p3 }
  0x15   : > { %3906 = sst [smem:[#allocation10_spill]] %s2966_s27  ;;  %p2297_p7 = scmp.ge.s32.totalorder %s2835_s21, 1 }
  0x16   : > { %p445_p8 = scmp.lt.s32.totalorder %s2835_s21, 3 }
  0x18   : > { %p446_p9 = pnand %p2297_p7, %p445_p8 }
  0x19   : > { %s3909_s1 = sld [smem:[#allocation12_spill]] (!%p446_p9)  ;;  %p497_p10 = scmp.lt.s32.totalorder (!%p446_p9), %s2951_s22, 1 }
  0x1a   : > { %449 = sbr.rel (%p446_p9) target bundleno = 3319 (0xcf7), region = 76  ;;  %s3910_s0 = sld [smem:[#allocation11_spill]] (!%p446_p9) }
  0x1b   : > { %s3911_s2 = sld [smem:[#allocation13_spill]] (!%p446_p9)  ;;  %s2837_s17 = smov (!%p446_p9), 104  }
  0x1c   : > { %s2838_s23 = smov (!%p446_p9), 120   ;;  %s2839_s20 = smov (!%p446_p9), 112  }
  0x1d   : > { %s3912_s5 = sld [smem:[#allocation15_spill]] (!%p446_p9)  ;;  %s2844_s30 = smov (!%p446_p9), 16  }
  0x1e   : > { %s3896_s16 = smov (!%p446_p9), 8   ;;  %s3913_s3 = sld [smem:[#allocation14_spill]] (!%p446_p9) }
  0x1f   : > { %v2575_v0 = vld [vmem:[%s3909_s1 + $0x8] sm:$0xff]  ;;  %v2574_v1 = vld [vmem:[%s3909_s1] sm:$0xff]  ;;  %s498_s25 = scalar_select %p497_p10, %s2951_s22, 1  ;;  %vm524_vm0 = vcmask 261120   ;;  %v2841_v14 = vmov 1983009808  }
  0x20   : > { %534 = vmatpush.bf16.msra.mxu0 %v2575_v0  ;;  %v557_v15 = vunpack.c.l.s4 %v2841_v14  ;;  %vm552_vm1 = vcmask 1047556   ;;  %v2842_v28 = vmov 1934713408   ;;  %vm919_vm2 = vcmask 64512   ;;  %s3914_s6 = sld [smem:[#allocation16_spill]]  ;;  %s3307_s27 = sand.u32 1, %s2827_s19  }
  0x21   : > { %s2300_s26 = sshll.u32 %s498_s25, 3  ;;  %v2700_v4 = vld [vmem:[%s3911_s2] ss:$0 sm:$0xff]  ;;  %v581_v29 = vunpack.c.l.s4 %v2842_v28  ;;  %vm1047_vm3 = vcmask 1043456   ;;  %vm1244_vm4 = vcmask 130048   ;;  %vm1246_vm5 = vcmask 195584  }
  0x22   : > { %s500_s24 = scalar_lea.vmem %s3910_s0, %s2300_s26  ;;  %v3005_v19 = vunpack.c.0.s8 %v557_v15  ;;  %s2843_s26 = smov 64  }
  0x23   : > { %v2989_v2 = vld [vmem:[%s500_s24] sm:$0xff]  ;;  %s2840_s24 = smov 96   ;;  %v3015_v34 = vunpack.c.0.s8 %v581_v29  ;;  %s3915_s7 = sld [smem:[#allocation17_spill]] }
  0x24   : > { %535 = vmatpush.bf16.msra.mxu0 %v2574_v1  ;;  %v503_v3 = vpack.c.bf16 %v2989_v2, %v2989_v2  ;;  %s2299_s25 = sshll.u32 %s3307_s27, 4  ;;  %s2622_s2 = sshll.u32 %s2951_s22, 4 }
  0x25   : > { %s3313_s0 = scalar_lea.vmem [#allocation4], %s2299_s25  ;;  %s2170_s1 = scalar_lea.sflag [#allocation5], %s3307_s27 }
  0x26   : > { %s2196_s25 = sshll.u32 %s3313_s0, 4  ;;  %s2197_s25 = int_to_ptr.vmem [resolvable:$true] %s2196_s25 }
  0x27   : > { %2309 = vmatmul.msk.bf16.vlgmr.msra.gmra.mxu0 %vm524_vm0, %v503_v3 }
  0xa4   : > { %v537_v5 = vpop.f32.mrf.mxu0 }
  0xa5   : > { %v538_v6 = vadd.f32 %v2700_v4, %v537_v5 }
  0xa7   : > { %548 = vrot.lane.b32.xlu1 %v538_v6, %s2837_s17  ;;  %542 = vrot.lane.b32.xlu0 %v538_v6, %s2838_s23  ;;  %v554_v16 = vrot.slane %v538_v6, 4  ;;  %s2846_s17 = smov 24  }
  0xac   : > { %v539_v7 = vpop.f32.mrf.mxu0 }
  0xaf   : > { %545 = vrot.lane.b32.xlu0 %v538_v6, %s2839_s20 }
 0x119   : > { %v543_v8 = vpop.permute.xlu0 %542  ;;  %v549_v10 = vpop.permute.xlu1 %548 }
 0x11a   : > { %v2997_v9 = vpack.i.bf16 %v543_v8, %v538_v6  ;;  %v564_v20 = vrot.slane %v549_v10, 4  ;;  %v566_v21 = vrot.slane %v543_v8, 4 }
 0x11c   : > { %2681 = vrot.lane.b32.xlu1 %v2997_v9, %s2840_s24  ;;  %v565_v24 = vsel %vm552_vm1, %v564_v20, %v543_v8  ;;  %v567_v25 = vsel %vm552_vm1, %v549_v10, %v566_v21 }
 0x11d   : > { %v571_v30 = vperm.slane %v565_v24, %v3005_v19  ;;  %v575_v31 = vperm.slane %v567_v25, %v3005_v19 }
 0x11f   : > { %v576_v35 = vrot.slane %v571_v30, 4  ;;  %v588_v36 = vrot.slane %v575_v31, 4 }
 0x121   : > { %v546_v11 = vpop.permute.xlu0 %545 }
 0x122   : > { %v3000_v12 = vpack.i.bf16 %v549_v10, %v546_v11  ;;  %v551_v13 = vrot.slane %v546_v11, 4  ;;  %v555_v18 = vsel %vm552_vm1, %v546_v11, %v554_v16 }
 0x123   : > { %v563_v23 = vperm.slane %v555_v18, %v3005_v19 }
 0x124   : > { %2686 = vrot.lane.b32.xlu2 %v3000_v12, %s2840_s24  ;;  %v553_v17 = vsel %vm552_vm1, %v551_v13, %v538_v6  ;;  %s2195_s24 = scalar_lea.hbm %s3892_s15, %s2622_s2 }
 0x125   : > { %v559_v22 = vperm.slane %v553_v17, %v3005_v19  ;;  %v590_v27 = vrot.slane %v563_v23, 4  ;;  %v589_v41 = vsel %vm552_vm1, %v588_v36, %v563_v23 }
 0x126   : > { %v595_v45 = vperm.slane %v589_v41, %v3015_v34 }
 0x127   : > { %v578_v26 = vrot.slane %v559_v22, 4  ;;  %v591_v33 = vsel %vm552_vm1, %v575_v31, %v590_v27  ;;  %v577_v40 = vsel %vm552_vm1, %v576_v35, %v559_v22 }
 0x128   : > { %v599_v38 = vperm.slane %v591_v33, %v3015_v34  ;;  %v583_v44 = vperm.slane %v577_v40, %v3015_v34  ;;  %v604_v55 = vrot.slane %v595_v45, 4 }
 0x129   : > { %v579_v32 = vsel %vm552_vm1, %v571_v30, %v578_v26 }
 0x12a   : > { %v587_v37 = vperm.slane %v579_v32, %v3015_v34  ;;  %v606_v47 = vrot.slane %v599_v38, 4  ;;  %v600_v53 = vrot.slane %v583_v44, 4  ;;  %v605_v10 = vsel %vm552_vm1, 0.0, %v604_v55 }
 0x12c   : > { %v602_v46 = vrot.slane %v587_v37, 4  ;;  %v607_v56 = vsel %vm552_vm1, 0.0, %v606_v47  ;;  %v601_v8 = vsel %vm552_vm1, 0.0, %v600_v53  ;;  %v619_v17 = vsel %vm552_vm1, %v606_v47, %v595_v45 }
 0x12d   : > { %v624_v0 = vrot.slane %v607_v56, 4  ;;  %v623_v36 = vperm.slane %v619_v17, %v3005_v19 }
 0x12e   : > { %v603_v54 = vsel %vm552_vm1, 0.0, %v602_v46  ;;  %v608_v11 = vsel %vm552_vm1, %v602_v46, %v583_v44 }
 0x12f   : > { %v613_v63 = vrot.slane %v603_v54, 4  ;;  %v625_v22 = vsel %vm552_vm1, %v624_v0, %v605_v10  ;;  %v612_v25 = vperm.slane %v608_v11, %v3005_v19 }
 0x130   : > { %v629_v35 = vperm.slane %v625_v22, %v3005_v19 }
 0x131   : > { %v614_v21 = vsel %vm552_vm1, %v613_v63, %v601_v8 }
 0x132   : > { %v618_v30 = vperm.slane %v614_v21, %v3005_v19 }
 0x134   : > { %v630_v47 = vrot.slane %v618_v30, 4 }
 0x17e   : > { %v2687_v39 = vpop.permute.xlu2 %2686 }
 0x17f   : > { %v2689_v42 = vunpack.i.h.bf16 %v2687_v39  ;;  %v2688_v43 = vunpack.i.l.bf16 %v2687_v39  ;;  %v632_v39 = vrot.slane %v612_v25, 4 }
 0x181   : > { %v690_v49 = vrot.slane %v2689_v42, 4  ;;  %v678_v50 = vrot.slane %v2688_v43, 4 }
 0x18e   : > { %v2682_v48 = vpop.permute.xlu1 %2681 }
 0x18f   : > { %v2684_v51 = vunpack.i.h.bf16 %v2682_v48  ;;  %v2683_v52 = vunpack.i.l.bf16 %v2682_v48 }
 0x191   : > { %v692_v57 = vrot.slane %v2684_v51, 4  ;;  %v679_v58 = vsel %vm552_vm1, %v678_v50, %v2683_v52  ;;  %v680_v59 = vrot.slane %v2683_v52, 4  ;;  %v691_v60 = vsel %vm552_vm1, %v690_v49, %v2684_v51 }
 0x192   : > { %v685_v61 = vperm.slane %v679_v58, %v3005_v19  ;;  %v697_v62 = vperm.slane %v691_v60, %v3005_v19  ;;  %v642_v51 = vrot.slane %v629_v35, 4  ;;  %v631_v60 = vsel %vm552_vm1, %v630_v47, %v612_v25 }
 0x193   : > { %v681_v1 = vsel %vm552_vm1, %v2688_v43, %v680_v59  ;;  %v693_v3 = vsel %vm552_vm1, %v2689_v42, %v692_v57  ;;  %v633_v57 = vsel %vm552_vm1, %v618_v30, %v632_v39  ;;  %v644_v59 = vrot.slane %v623_v36, 4 }
 0x194   : > { %v689_v4 = vperm.slane %v681_v1, %v3005_v19  ;;  %v701_v5 = vperm.slane %v693_v3, %v3005_v19  ;;  %v702_v6 = vrot.slane %v697_v62, 4  ;;  %v704_v7 = vrot.slane %v685_v61, 4 }
 0x195   : > { %v643_v0 = vsel %vm552_vm1, %v642_v51, %v623_v36 }
 0x196   : > { %v703_v13 = vsel %vm552_vm1, %v702_v6, %v685_v61  ;;  %v705_v14 = vsel %vm552_vm1, %v697_v62, %v704_v7  ;;  %v714_v15 = vrot.slane %v701_v5, 4  ;;  %v716_v16 = vrot.slane %v689_v4, 4 }
 0x197   : > { %v709_v18 = vperm.slane %v703_v13, %v3015_v34  ;;  %v713_v20 = vperm.slane %v705_v14, %v3015_v34  ;;  %v637_v7 = vperm.slane %v631_v60, %v3015_v34 }
 0x198   : > { %v715_v23 = vsel %vm552_vm1, %v714_v15, %v689_v4  ;;  %v717_v24 = vsel %vm552_vm1, %v701_v5, %v716_v16  ;;  %v641_v5 = vperm.slane %v633_v57, %v3015_v34  ;;  %v645_v15 = vsel %vm552_vm1, %v629_v35, %v644_v59 }
 0x199   : > { %v721_v26 = vperm.slane %v715_v23, %v3015_v34  ;;  %v725_v27 = vperm.slane %v717_v24, %v3015_v34  ;;  %v726_v28 = vrot.slane %v709_v18, 4  ;;  %v728_v29 = vrot.slane %v713_v20, 4 }
 0x19a   : > { %v649_v16 = vperm.slane %v643_v0, %v3015_v34  ;;  %v660_v21 = vrot.slane %v641_v5, 4 }
 0x19b   : > { %v729_v31 = vsel %vm552_vm1, 0.0, %v728_v29  ;;  %v730_v32 = vrot.slane %v721_v26, 4  ;;  %v732_v33 = vrot.slane %v725_v27, 4  ;;  %v734_v37 = vsel %vm552_vm1, %v728_v29, %v709_v18 }
 0x19c   : > { %v739_v38 = vrot.slane %v729_v31, 4  ;;  %v727_v40 = vsel %vm552_vm1, 0.0, %v726_v28  ;;  %v738_v42 = vperm.slane %v734_v37, %v3005_v19  ;;  %v656_v27 = vrot.slane %v637_v7, 4 }
 0x19d   : > { %v733_v41 = vsel %vm552_vm1, 0.0, %v732_v33  ;;  %v745_v43 = vsel %vm552_vm1, %v732_v33, %v721_v26  ;;  %v731_v48 = vsel %vm552_vm1, 0.0, %v730_v32  ;;  %v653_v26 = vperm.slane %v645_v15, %v3015_v34 }
 0x19e   : > { %v750_v44 = vrot.slane %v733_v41, 4  ;;  %v740_v45 = vsel %vm552_vm1, %v739_v38, %v727_v40  ;;  %v749_v46 = vperm.slane %v745_v43, %v3005_v19  ;;  %v758_v50 = vrot.slane %v738_v42, 4  ;;  %v918_v43 = vld [vmem:[%s3912_s5] sm:$0xff]  ;;  %s2761_s5 = scalar_lea.hbm %s3892_s15, 32 }
 0x19f   : > { %v744_v49 = vperm.slane %v740_v45, %v3005_v19  ;;  %v661_v30 = vsel %vm552_vm1, %v653_v26, %v660_v21  ;;  %v654_v31 = vrot.slane %v649_v16, 4  ;;  %v657_v35 = vsel %vm552_vm1, %v649_v16, %v656_v27 }
 0x1a0   : > { %v751_v52 = vsel %vm552_vm1, %v750_v44, %v731_v48  ;;  %v770_v53 = vrot.slane %v749_v46, 4  ;;  %v665_v36 = vpack.c.bf16 %v661_v30, %v661_v30  ;;  %v663_v38 = vpack.c.bf16 %v657_v35, %v657_v35 }
 0x1a1   : > { %v755_v54 = vperm.slane %v751_v52, %v3005_v19  ;;  %v759_v55 = vsel %vm552_vm1, %v744_v49, %v758_v50  ;;  %v756_v56 = vrot.slane %v744_v49, 4  ;;  %v655_v37 = vsel %vm552_vm1, %v654_v31, %v637_v7 }
 0x1a2   : > { %v767_v58 = vperm.slane %v759_v55, %v3015_v34  ;;  %v662_v39 = vpack.c.bf16 %v655_v37, %v655_v37  ;;  %v658_v40 = vrot.slane %v653_v26, 4 }
 0x1a3   : > { %v771_v61 = vsel %vm552_vm1, %v755_v54, %v770_v53  ;;  %v757_v62 = vsel %vm552_vm1, %v756_v56, %v738_v42  ;;  %v768_v63 = vrot.slane %v755_v54, 4 }
 0x1a4   : > { %v779_v1 = vperm.slane %v771_v61, %v3015_v34  ;;  %v786_v3 = vrot.slane %v767_v58, 4  ;;  %v763_v4 = vperm.slane %v757_v62, %v3015_v34  ;;  %v659_v41 = vsel %vm552_vm1, %v658_v40, %v641_v5 }
 0x1a5   : > { %v769_v6 = vsel %vm552_vm1, %v768_v63, %v749_v46  ;;  %v664_v42 = vpack.c.bf16 %v659_v41, %v659_v41 }
 0x1a6   : > { %v787_v8 = vsel %vm552_vm1, %v779_v1, %v786_v3  ;;  %v775_v10 = vperm.slane %v769_v6, %v3015_v34  ;;  %v782_v11 = vrot.slane %v763_v4, 4  ;;  %v784_v13 = vrot.slane %v779_v1, 4 }
 0x1a7   : > { %v791_v14 = vpack.c.bf16 %v787_v8, %v787_v8 }
 0x1a8   : > { %v783_v17 = vsel %vm552_vm1, %v775_v10, %v782_v11  ;;  %v780_v18 = vrot.slane %v775_v10, 4  ;;  %v785_v20 = vsel %vm552_vm1, %v784_v13, %v767_v58 }
 0x1a9   : > { %v981_v22 = vsel %vm919_vm2, %v791_v14, 0  ;;  %v789_v23 = vpack.c.bf16 %v783_v17, %v783_v17  ;;  %v790_v25 = vpack.c.bf16 %v785_v20, %v785_v20 }
 0x1aa   : > { %990 = vmatpush.bf16.xpose.msrb.mxu0 %v981_v22  ;;  %v781_v24 = vsel %vm552_vm1, %v780_v18, %v763_v4 }
 0x1ab   : > { %v943_v28 = vsel %vm919_vm2, %v789_v23, 0  ;;  %v788_v29 = vpack.c.bf16 %v781_v24, %v781_v24  ;;  %v962_v33 = vsel %vm919_vm2, %v790_v25, 0 }
 0x1ac   : > { %952 = vmatpush.bf16.xpose.msra.mxu2 %v943_v28 }
 0x1ad   : > { %v924_v32 = vsel %vm919_vm2, %v788_v29, 0 }
 0x1ae   : > { %933 = vmatpush.bf16.xpose.msra.mxu1 %v924_v32 }
 0x1b1   : > { %2313 = vmatmul.msk.bf16.vlgmr.msrb.gmra.mxu0 %vm919_vm2, %v665_v36 }
 0x1b3   : > { %2311 = vmatmul.msk.bf16.vlgmr.msra.gmra.mxu2 %vm919_vm2, %v663_v38 }
 0x1b5   : > { %2310 = vmatmul.msk.bf16.vlgmr.msra.gmra.mxu1 %vm919_vm2, %v662_v39 }
 0x1b6   : > { %971 = vmatpush.bf16.xpose.msrb.mxu1 %v962_v33 }
 0x1c5   : > { %2312 = vmatmul.msk.bf16.vlgmr.msrb.gmra.mxu1 %vm919_vm2, %v664_v42 }
 0x22e   : > { %v992_v44 = vpop.f32.mrf.mxu0 }
 0x22f   : > { %v993_v45 = vadd.f32 %v992_v44, %v918_v43 }
 0x231   : > { %v1005_v46 = vsel %vm919_vm2, %v993_v45, -inf }
 0x232   : > { %1006 = vmax.xlane.f32.xlu2 %v1005_v46  ;;  %v935_v47 = vpop.f32.mrf.mxu1 }
 0x233   : > { %v936_v48 = vadd.f32 %v935_v47, %v918_v43 }
 0x235   : > { %v996_v49 = vsel %vm919_vm2, %v936_v48, -inf }
 0x236   : > { %v954_v50 = vpop.f32.mrf.mxu2  ;;  %v994_v51 = vpop.f32.mrf.mxu0  ;;  %997 = vmax.xlane.f32.xlu1 %v996_v49 }
 0x237   : > { %v955_v52 = vadd.f32 %v954_v50, %v918_v43 }
 0x239   : > { %v999_v53 = vsel %vm919_vm2, %v955_v52, -inf }
 0x23a   : > { %1000 = vmax.xlane.f32.xlu0 %v999_v53  ;;  %v937_v54 = vpop.f32.mrf.mxu1 }
 0x23e   : > { %v956_v55 = vpop.f32.mrf.mxu2 }
 0x242   : > { %v973_v56 = vpop.f32.mrf.mxu1 }
 0x243   : > { %v974_v57 = vadd.f32 %v973_v56, %v918_v43 }
 0x245   : > { %v1002_v58 = vsel %vm919_vm2, %v974_v57, -inf }
 0x246   : > { %1003 = vmax.xlane.f32.xlu2 %v1002_v58 }
 0x24a   : > { %v975_v59 = vpop.f32.mrf.mxu1 }
 0x24e   : > { %2696 = vrot.lane.b32.xlu0 %v3000_v12, %s2843_s26 }
 0x25e   : > { %2691 = vrot.lane.b32.xlu2 %v2997_v9, %s2843_s26 }
 0x2a5   : > { %v1007_v60 = vpop.xlane.xlu2 %1006 }
 0x2a6   : > { %v1011_v61 = vsub.f32 %v993_v45, %v1007_v60 }
 0x2a8   : > { %v1018_v62 = vmul.f32 1.442695, %v1011_v61 }
 0x2a9   : > { %v998_v6 = vpop.xlane.xlu1 %997 }
 0x2aa   : > { %2707 = vpow2.f32 %v1018_v62  ;;  %v1008_v8 = vsub.f32 %v936_v48, %v998_v6 }
 0x2ac   : > { %v1012_v11 = vmul.f32 1.442695, %v1008_v8 }
 0x2ad   : > { %v1001_v63 = vpop.xlane.xlu0 %1000 }
 0x2ae   : > { %v1009_v0 = vsub.f32 %v955_v52, %v1001_v63 }
 0x2b0   : > { %v3104_v1 = vpop.eup %2707  ;;  %v1014_v3 = vmul.f32 1.442695, %v1009_v0 }
 0x2b1   : > { %v1029_v4 = vsel %vm919_vm2, %v3104_v1, 0.0 }
 0x2b2   : > { %2709 = vpow2.f32 %v1014_v3  ;;  %1030 = vadd.xlane.f32.xlu0 %v1029_v4 }
 0x2b8   : > { %v3108_v5 = vpop.eup %2709 }
 0x2b9   : > { %v1004_v12 = vpop.xlane.xlu2 %1003  ;;  %v1023_v9 = vsel %vm919_vm2, %v3108_v5, 0.0 }
 0x2ba   : > { %v1010_v7 = vsub.f32 %v974_v57, %v1004_v12  ;;  %1024 = vadd.xlane.f32.xlu1 %v1023_v9 }
 0x2bc   : > { %v1016_v10 = vmul.f32 1.442695, %v1010_v7 }
 0x2be   : > { %2711 = vpow2.f32 %v1016_v10 }
 0x2bf   : > { %2713 = vpow2.f32 %v1012_v11 }
 0x2c0   : > { %v2697_v13 = vpop.permute.xlu0 %2696 }
 0x2c1   : > { %v2699_v14 = vunpack.i.h.bf16 %v2697_v13  ;;  %v2698_v15 = vunpack.i.l.bf16 %v2697_v13  ;;  %v2692_v16 = vpop.permute.xlu2 %2691 }
 0x2c2   : > { %v2694_v17 = vunpack.i.h.bf16 %v2692_v16  ;;  %v2693_v18 = vunpack.i.l.bf16 %v2692_v16 }
 0x2c3   : > { %v816_v20 = vrot.slane %v2699_v14, 4  ;;  %v804_v21 = vrot.slane %v2698_v15, 4 }
 0x2c4   : > { %v3112_v22 = vpop.eup %2711  ;;  %v818_v23 = vrot.slane %v2694_v17, 4  ;;  %v806_v24 = vrot.slane %v2693_v18, 4 }
 0x2c5   : > { %v817_v25 = vsel %vm552_vm1, %v816_v20, %v2694_v17  ;;  %v805_v26 = vsel %vm552_vm1, %v804_v21, %v2693_v18  ;;  %v1026_v27 = vsel %vm919_vm2, %v3112_v22, 0.0  ;;  %v3124_v39 = vpop.eup %2713 }
 0x2c6   : > { %v819_v28 = vsel %vm552_vm1, %v2699_v14, %v818_v23  ;;  %v823_v29 = vperm.slane %v817_v25, %v3005_v19  ;;  %v807_v30 = vsel %vm552_vm1, %v2698_v15, %v806_v24  ;;  %v811_v31 = vperm.slane %v805_v26, %v3005_v19  ;;  %1027 = vadd.xlane.f32.xlu1 %v1026_v27 }
 0x2c7   : > { %v827_v32 = vperm.slane %v819_v28, %v3005_v19  ;;  %v815_v33 = vperm.slane %v807_v30, %v3005_v19  ;;  %v1020_v50 = vsel %vm919_vm2, %v3124_v39, 0.0 }
 0x2c8   : > { %v828_v35 = vrot.slane %v823_v29, 4  ;;  %v830_v36 = vrot.slane %v811_v31, 4 }
 0x2c9   : > { %v840_v37 = vrot.slane %v827_v32, 4  ;;  %v842_v38 = vrot.slane %v815_v33, 4 }
 0x2ca   : > { %v829_v40 = vsel %vm552_vm1, %v828_v35, %v811_v31  ;;  %v831_v41 = vsel %vm552_vm1, %v823_v29, %v830_v36 }
 0x2cb   : > { %v835_v42 = vperm.slane %v829_v40, %v3015_v34  ;;  %v839_v43 = vperm.slane %v831_v41, %v3015_v34  ;;  %v841_v44 = vsel %vm552_vm1, %v840_v37, %v815_v33  ;;  %v843_v45 = vsel %vm552_vm1, %v827_v32, %v842_v38 }
 0x2cc   : > { %v847_v46 = vperm.slane %v841_v44, %v3015_v34  ;;  %v851_v47 = vperm.slane %v843_v45, %v3015_v34 }
 0x2cd   : > { %v852_v48 = vrot.slane %v835_v42, 4  ;;  %v854_v49 = vrot.slane %v839_v43, 4 }
 0x2ce   : > { %v856_v51 = vrot.slane %v847_v46, 4  ;;  %v858_v52 = vrot.slane %v851_v47, 4  ;;  %1021 = vadd.xlane.f32.xlu1 %v1020_v50 }
 0x2cf   : > { %v855_v53 = vsel %vm552_vm1, 0.0, %v854_v49  ;;  %v860_v54 = vsel %vm552_vm1, %v854_v49, %v835_v42  ;;  %v853_v58 = vsel %vm552_vm1, 0.0, %v852_v48 }
 0x2d0   : > { %v859_v55 = vsel %vm552_vm1, 0.0, %v858_v52  ;;  %v864_v56 = vperm.slane %v860_v54, %v3005_v19  ;;  %v865_v57 = vrot.slane %v855_v53, 4  ;;  %v871_v60 = vsel %vm552_vm1, %v858_v52, %v847_v46 }
 0x2d1   : > { %v876_v59 = vrot.slane %v859_v55, 4  ;;  %v857_v61 = vsel %vm552_vm1, 0.0, %v856_v51  ;;  %v875_v63 = vperm.slane %v871_v60, %v3005_v19 }
 0x2d2   : > { %v866_v62 = vsel %vm552_vm1, %v865_v57, %v853_v58  ;;  %v884_v0 = vrot.slane %v864_v56, 4 }
 0x2d3   : > { %v870_v3 = vperm.slane %v866_v62, %v3005_v19  ;;  %v877_v4 = vsel %vm552_vm1, %v876_v59, %v857_v61  ;;  %v896_v12 = vrot.slane %v875_v63, 4 }
 0x2d4   : > { %v881_v6 = vperm.slane %v877_v4, %v3005_v19 }
 0x2d5   : > { %v885_v9 = vsel %vm552_vm1, %v870_v3, %v884_v0  ;;  %v882_v7 = vrot.slane %v870_v3, 4 }
 0x2d6   : > { %v893_v8 = vperm.slane %v885_v9, %v3015_v34  ;;  %v897_v10 = vsel %vm552_vm1, %v881_v6, %v896_v12  ;;  %v894_v11 = vrot.slane %v881_v6, 4 }
 0x2d7   : > { %v905_v13 = vperm.slane %v897_v10, %v3015_v34  ;;  %v883_v14 = vsel %vm552_vm1, %v882_v7, %v864_v56 }
 0x2d8   : > { %v912_v15 = vrot.slane %v893_v8, 4  ;;  %v889_v16 = vperm.slane %v883_v14, %v3015_v34  ;;  %v895_v17 = vsel %vm552_vm1, %v894_v11, %v875_v63 }
 0x2d9   : > { %v910_v18 = vrot.slane %v905_v13, 4  ;;  %v901_v20 = vperm.slane %v895_v17, %v3015_v34 }
 0x2da   : > { %v913_v21 = vsel %vm552_vm1, %v905_v13, %v912_v15  ;;  %v908_v23 = vrot.slane %v889_v16, 4 }
 0x2db   : > { %v917_v24 = vpack.c.bf16 %v913_v21, %v913_v21  ;;  %v911_v25 = vsel %vm552_vm1, %v910_v18, %v893_v8  ;;  %v906_v26 = vrot.slane %v901_v20, 4 }
 0x2dc   : > { %v916_v27 = vpack.c.bf16 %v911_v25, %v911_v25  ;;  %v909_v28 = vsel %vm552_vm1, %v901_v20, %v908_v23 }
 0x2dd   : > { %v1106_v29 = vsel %vm1047_vm3, %v917_v24, 0  ;;  %v915_v30 = vpack.c.bf16 %v909_v28, %v909_v28  ;;  %v907_v31 = vsel %vm552_vm1, %v906_v26, %v889_v16 }
 0x2de   : > { %1115 = vmatpush.bf16.msra.mxu0 %v1106_v29  ;;  %v1087_v32 = vsel %vm1047_vm3, %v916_v27, 0  ;;  %v914_v33 = vpack.c.bf16 %v907_v31, %v907_v31 }
 0x2df   : > { %1096 = vmatpush.bf16.msra.mxu3 %v1087_v32  ;;  %v1068_v35 = vsel %vm1047_vm3, %v915_v30, 0 }
 0x2e0   : > { %1077 = vmatpush.bf16.msrb.mxu2 %v1068_v35  ;;  %v1049_v36 = vsel %vm1047_vm3, %v914_v33, 0 }
 0x2e1   : > { %1058 = vmatpush.bf16.msra.mxu1 %v1049_v36 }
 0x325   : > { %v1031_v37 = vpop.xlane.xlu0 %1030 }
 0x326   : > { %2715 = vrcp.f32 %v1031_v37 }
 0x32c   : > { %v2716_v38 = vpop.eup %2715 }
 0x32d   : > { %v1039_v40 = vmul.f32 %v2716_v38, %v3104_v1  ;;  %v1025_v41 = vpop.xlane.xlu1 %1024 }
 0x32e   : > { %2717 = vrcp.f32 %v1025_v41 }
 0x32f   : > { %v1043_v42 = vpack.c.bf16 %v1039_v40, %v1039_v40 }
 0x331   : > { %2317 = vmatmul.msk.bf16.vlgmr.msra.gmra.mxu0 %vm919_vm2, %v1043_v42 }
 0x334   : > { %v2718_v43 = vpop.eup %2717 }
 0x335   : > { %v1037_v44 = vmul.f32 %v2718_v43, %v3108_v5 }
 0x337   : > { %v1041_v45 = vpack.c.bf16 %v1037_v44, %v1037_v44 }
 0x339   : > { %2315 = vmatmul.msk.bf16.vlgmr.msrb.gmra.mxu2 %vm919_vm2, %v1041_v45  ;;  %v1028_v46 = vpop.xlane.xlu1 %1027 }
 0x33a   : > { %2719 = vrcp.f32 %v1028_v46 }
 0x340   : > { %v2720_v47 = vpop.eup %2719 }
 0x341   : > { %v1022_v48 = vpop.xlane.xlu1 %1021  ;;  %v1038_v49 = vmul.f32 %v2720_v47, %v3112_v22 }
 0x342   : > { %2721 = vrcp.f32 %v1022_v48 }
 0x343   : > { %v1042_v50 = vpack.c.bf16 %v1038_v49, %v1038_v49 }
 0x345   : > { %2316 = vmatmul.msk.bf16.vlgmr.msra.gmra.mxu3 %vm919_vm2, %v1042_v50 }
 0x348   : > { %v2722_v1 = vpop.eup %2721 }
 0x349   : > { %v1036_v51 = vmul.f32 %v2722_v1, %v3124_v39 }
 0x34b   : > { %v1040_v52 = vpack.c.bf16 %v1036_v51, %v1036_v51 }
 0x34d   : > { %2314 = vmatmul.msk.bf16.vlgmr.msra.gmra.mxu1 %vm919_vm2, %v1040_v52 }
 0x3ae   : > { %v1117_v5 = vpop.f32.mrf.mxu0 }
 0x3af   : > { %v1133_v55 = vrot.slane %v1117_v5, 4 }
 0x3b6   : > { %v1119_v53 = vpop.f32.mrf.mxu0 }
 0x3bc   : > { %v1079_v54 = vpop.f32.mrf.mxu2 }
 0x3bd   : > { %v1135_v56 = vrot.slane %v1079_v54, 4  ;;  %v1134_v58 = vsel %vm552_vm1, %v1133_v55, %v1079_v54 }
 0x3be   : > { %v1140_v59 = vperm.slane %v1134_v58, %v3005_v19 }
 0x3bf   : > { %v1136_v22 = vsel %vm552_vm1, %v1117_v5, %v1135_v56 }
 0x3c0   : > { %v1144_v62 = vperm.slane %v1136_v22, %v3005_v19  ;;  %v1145_v3 = vrot.slane %v1140_v59, 4 }
 0x3c2   : > { %v1157_v12 = vrot.slane %v1144_v62, 4 }
 0x3c4   : > { %v1081_v57 = vpop.f32.mrf.mxu2 }
 0x3c8   : > { %v1098_v60 = vpop.f32.mrf.mxu3 }
 0x3c9   : > { %v1121_v61 = vrot.slane %v1098_v60, 4 }
 0x3ca   : > { %v1060_v39 = vpop.f32.mrf.mxu1 }
 0x3cb   : > { %v1122_v63 = vsel %vm552_vm1, %v1121_v61, %v1060_v39  ;;  %v1123_v0 = vrot.slane %v1060_v39, 4 }
 0x3cc   : > { %v1128_v4 = vperm.slane %v1122_v63, %v3005_v19 }
 0x3cd   : > { %v1124_v6 = vsel %vm552_vm1, %v1098_v60, %v1123_v0 }
 0x3ce   : > { %v1132_v9 = vperm.slane %v1124_v6, %v3005_v19  ;;  %v1146_v7 = vsel %vm552_vm1, %v1145_v3, %v1128_v4  ;;  %v1147_v8 = vrot.slane %v1128_v4, 4  ;;  %v2701_v4 = vld [vmem:[%s3881_s4] ss:$0 sm:$0xff] }
 0x3cf   : > { %v1152_v10 = vperm.slane %v1146_v7, %v3015_v34 }
 0x3d0   : > { %v1148_v11 = vsel %vm552_vm1, %v1140_v59, %v1147_v8  ;;  %v1158_v13 = vsel %vm552_vm1, %v1157_v12, %v1132_v9  ;;  %v1159_v14 = vrot.slane %v1132_v9, 4  ;;  %v1100_v15 = vpop.f32.mrf.mxu3  ;;  %v2576_v59 = vld [vmem:[%s3913_s3] sm:$0xff] }
 0x3d1   : > { %v1156_v16 = vperm.slane %v1148_v11, %v3015_v34  ;;  %v1164_v17 = vperm.slane %v1158_v13, %v3015_v34  ;;  %v1169_v23 = vrot.slane %v1152_v10, 4 }
 0x3d2   : > { %v1160_v18 = vsel %vm552_vm1, %v1144_v62, %v1159_v14  ;;  %v1062_v20 = vpop.f32.mrf.mxu1 }
 0x3d3   : > { %v1168_v21 = vperm.slane %v1160_v18, %v3015_v34  ;;  %v1171_v24 = vrot.slane %v1156_v16, 4  ;;  %v1173_v26 = vrot.slane %v1164_v17, 4  ;;  %v1170_v31 = vsel %vm552_vm1, 0.0, %v1169_v23 }
 0x3d5   : > { %v1172_v25 = vsel %vm552_vm1, 0.0, %v1171_v24  ;;  %v1175_v27 = vrot.slane %v1168_v21, 4  ;;  %v1177_v28 = vsel %vm552_vm1, %v1171_v24, %v1152_v10  ;;  %v1174_v38 = vsel %vm552_vm1, 0.0, %v1173_v26  ;;  %v2337_v24 = vld [vmem:[%s3914_s6 + $0x10] sm:$0xf] }
 0x3d6   : > { %v1182_v29 = vrot.slane %v1172_v25, 4  ;;  %v1181_v30 = vperm.slane %v1177_v28, %v3005_v19  ;;  %v2847_v10 = vmov 32.0   ;;  %v2581_v25 = vld [vmem:[%s3914_s6 + $0x14] sm:$0xf0]  ;;  %v2580_v26 = vld [vmem:[%s3914_s6 + $0x14] sm:$0xf] }
 0x3d7   : > { %v1176_v32 = vsel %vm552_vm1, 0.0, %v1175_v27  ;;  %v1188_v33 = vsel %vm552_vm1, %v1175_v27, %v1164_v17  ;;  %2723 = vrcp.f32 %v2847_v10  ;;  %v2338_v27 = vor.u32 %v2581_v25, %v2337_v24  ;;  %v2339_v28 = vld [vmem:[%s3914_s6 + $0x18] sm:$0xf0] }
 0x3d8   : > { %v1193_v35 = vrot.slane %v1176_v32, 4  ;;  %v1183_v36 = vsel %vm552_vm1, %v1182_v29, %v1170_v31  ;;  %v1192_v37 = vperm.slane %v1188_v33, %v3005_v19  ;;  %v1201_v41 = vrot.slane %v1181_v30, 4  ;;  %v2357_v29 = vld [vmem:[%s3887_s10 + $0x10] sm:$0xf]  ;;  %v2584_v33 = vld [vmem:[%s3887_s10 + $0x14] sm:$0xf] }
 0x3d9   : > { %v1187_v40 = vperm.slane %v1183_v36, %v3005_v19  ;;  %v2342_v31 = vor.u32 %v2580_v26, %v2339_v28  ;;  %1361 = vmatpush.bf16.msra.mxu2 %v2338_v27 }
 0x3da   : > { %v1194_v42 = vsel %vm552_vm1, %v1193_v35, %v1174_v38  ;;  %v1213_v43 = vrot.slane %v1192_v37, 4  ;;  %v2359_v35 = vld [vmem:[%s3887_s10 + $0x18] sm:$0xf0]  ;;  %v2579_v38 = vld [vmem:[%s3914_s6 + $0x4] sm:$0xf0] }
 0x3db   : > { %v1198_v44 = vperm.slane %v1194_v42, %v3005_v19  ;;  %v1199_v45 = vrot.slane %v1187_v40, 4  ;;  %v1202_v46 = vsel %vm552_vm1, %v1187_v40, %v1201_v41  ;;  %v2362_v36 = vor.u32 %v2584_v33, %v2359_v35  ;;  %1374 = vmatpush.bf16.msrb.mxu3 %v2342_v31  ;;  %v2578_v40 = vld [vmem:[%s3914_s6 + $0x4] sm:$0xf]  ;;  %v2331_v42 = vld [vmem:[%s3914_s6 + $0x8] sm:$0xf0] }
 0x3dc   : > { %v1210_v52 = vperm.slane %v1202_v46, %v3015_v34 }
 0x3dd   : > { %v1214_v47 = vsel %vm552_vm1, %v1198_v44, %v1213_v43  ;;  %v1200_v48 = vsel %vm552_vm1, %v1199_v45, %v1181_v30  ;;  %v1211_v49 = vrot.slane %v1198_v44, 4  ;;  %v2724_v11 = vpop.eup %2723  ;;  %v2585_v30 = vld [vmem:[%s3887_s10 + $0x14] sm:$0xf0]  ;;  %v2349_v43 = vld [vmem:[%s3887_s10] sm:$0xf]  ;;  %v2334_v45 = vor.u32 %v2578_v40, %v2331_v42 }
 0x3de   : > { %v1222_v50 = vperm.slane %v1214_v47, %v3015_v34  ;;  %v1206_v1 = vperm.slane %v1200_v48, %v3015_v34  ;;  %v1229_v58 = vrot.slane %v1210_v52, 4  ;;  %v1292_v13 = vmul.f32 32.0, %v2724_v11  ;;  %v2583_v44 = vld [vmem:[%s3887_s10 + $0x4] sm:$0xf0]  ;;  %v2582_v47 = vld [vmem:[%s3887_s10 + $0x4] sm:$0xf] }
 0x3df   : > { %v1212_v51 = vsel %vm552_vm1, %v1211_v49, %v1192_v37  ;;  %vm1296_vm6 = vweird.f32 %v2724_v11  ;;  %v2358_v32 = vor.u32 %v2585_v30, %v2357_v29  ;;  %v2329_v37 = vld [vmem:[%s3914_s6] sm:$0xf]  ;;  %v2350_v46 = vor.u32 %v2583_v44, %v2349_v43  ;;  %v2351_v48 = vld [vmem:[%s3887_s10 + $0x8] sm:$0xf0]  ;;  %1375 = vmatpush.bf16.msrb.mxu3 %v2334_v45 }
 0x3e0   : > { %v1227_v5 = vrot.slane %v1222_v50, 4  ;;  %v1218_v53 = vperm.slane %v1212_v51, %v3015_v34  ;;  %v1225_v19 = vrot.slane %v1206_v1, 4  ;;  %v1230_v22 = vsel %vm552_vm1, %v1222_v50, %v1229_v58  ;;  %v2577_v34 = vld [vmem:[%s3913_s3 + $0x8] sm:$0xff]  ;;  %v2703_v58 = vld [vmem:[%s3881_s4 + $0x2] ss:$0 sm:$0xff] }
 0x3e1   : > { %1280 = vmatpush.bf16.msrb.mxu1 %v2577_v34  ;;  %v1293_v14 = vsub.f32 1.0, %v1292_v13  ;;  %1517 = vmatpush.bf16.msrb.mxu0 %v2358_v32  ;;  %v2330_v41 = vor.u32 %v2579_v38, %v2329_v37  ;;  %v2354_v49 = vor.u32 %v2582_v47, %v2351_v48  ;;  %v3321_v48 = vld [vmem:[%s3885_s8] ss:$0 sm:$0xff] }
 0x3e2   : > { %v1228_v54 = vsel %vm552_vm1, %v1227_v5, %v1210_v52  ;;  %v1223_v55 = vrot.slane %v1218_v53, 4  ;;  %v1226_v56 = vsel %vm552_vm1, %v1218_v53, %v1225_v19 }
 0x3e3   : > { %1236 = vrot.lane.b32.xlu1 %v1228_v54, %s2844_s30  ;;  %1232 = vrot.lane.b32.xlu2 %v1226_v56, %s3896_s16  ;;  %v1294_v15 = vmul.f32 %v2724_v11, %v1293_v14  ;;  %v2702_v56 = vld [vmem:[%s3881_s4 + $0x1] ss:$0 sm:$0xff]  ;;  %s2198_s16 = sshll.u32 %s2195_s24, 4  ;;  %s2199_s16 = int_to_ptr.hbm [resolvable:$true] %s2198_s16 }
 0x3e4   : > { %v1224_v57 = vsel %vm552_vm1, %v1223_v55, %v1206_v1  ;;  %1362 = vmatpush.bf16.msra.mxu2 %v2330_v41  ;;  %s2755_s26 = sshra.s32 %s2199_s16, 4  ;;  %s2756_s26 = int_to_ptr.hbm [resolvable:$true] %s2755_s26 }
 0x3e5   : > { %1281 = vmatpush.bf16.msrb.mxu1 %v2576_v59  ;;  %v1295_v16 = vadd.f32 %v2724_v11, %v1294_v15  ;;  %1518 = vmatpush.bf16.msrb.mxu0 %v2350_v46  ;;  %s2757_s30 = scalar_lea.hbm %s2756_s26, 16  ;;  %p2762_p0 = scmp.lt.s32.totalorder %s2756_s26, %s3892_s15 }
 0x3e6   : > { %p2758_p11 = scmp.ne.s32.totalorder %s2756_s26, %s2757_s30  ;;  %p2763_p1 = scmp.lt.s32.totalorder %s2761_s5, %s2757_s30 }
 0x3e7   : > { %v3226_v17 = vsel %vm1296_vm6, %v2724_v11, %v1295_v16 }
 0x3e8   : > { %p2759_p12 = pnand %p2758_p11, %p2968_p5  ;;  %p2764_p2 = por %p2763_p1, %p2762_p0 }
 0x3e9   : > { %1530 = vmatpush.bf16.msra.mxu1 %v2362_v36 }
 0x3ea   : > { %p2760_p13 = pneg %p2759_p12 }
 0x3eb   : > { %1240 = vrot.lane.b32.xlu2 %v1230_v22, %s2846_s17 }
 0x3ec   : > { %p2765_p3 = pnand %p2764_p2, %p2760_p13 }
 0x3ed   : > { %1531 = vmatpush.bf16.msra.mxu1 %v2354_v49 }
 0x43d   : > { %v1233_v60 = vpop.permute.xlu2 %1232 }
 0x43e   : > { %v1243_v61 = vsel %vm919_vm2, %v1224_v57, %v1233_v60 }
 0x445   : > { %v1241_v39 = vpop.permute.xlu2 %1240 }
 0x455   : > { %v1237_v62 = vpop.permute.xlu1 %1236 }
 0x456   : > { %v1245_v63 = vsel %vm1244_vm4, %v1243_v61, %v1237_v62  ;;  %v1326_v61 = vld [vmem:[%s3915_s7] sm:$0x3] }
 0x457   : > { %v1247_v0 = vsel %vm1246_vm5, %v1245_v63, %v1241_v39  ;;  %v1328_v63 = vperm.slane %v1326_v61, 0 }
 0x458   : > { %v1253_v3 = vpack.c.bf16 %v1247_v0, %v1247_v0  ;;  %v1329_v0 = vperm.slane %v1326_v61, 1  ;;  %v1629_v61 = vld [vmem:[%s3890_s13 + $0x70] sm:$0xff] }
 0x45a   : > { %2326 = vmatmul.msk.bf16.vlgmr.msrb.gmra.mxu1 %vm524_vm0, %v1253_v3 }
 0x4d7   : > { %v1283_v6 = vpop.f32.mrf.mxu1 }
 0x4d8   : > { %v1284_v12 = vadd.f32 %v2701_v4, %v1283_v6 }
 0x4da   : > { %v1287_v9 = vadd.f32 %v1284_v12, %v2989_v2 }
 0x4dc   : > { %v1288_v7 = vsel %vm524_vm0, %v1287_v9, 0.0 }
 0x4dd   : > { %1289 = vadd.xlane.f32.xlu2 %v1288_v7 }
 0x4df   : > { %v1285_v8 = vpop.f32.mrf.mxu1 }
 0x550   : > { %v1290_v18 = vpop.xlane.xlu2 %1289 }
 0x551   : > { %v1298_v20 = vmul.f32 %v3226_v17, %v1290_v18 }
 0x553   : > { %v1299_v21 = vsub.f32 %v1287_v9, %v1298_v20 }
 0x555   : > { %v1300_v23 = vmul.f32 %v1299_v21, %v1299_v21 }
 0x557   : > { %v1301_v2 = vsel %vm524_vm0, %v1300_v23, 0.0 }
 0x558   : > { %1302 = vadd.xlane.f32.xlu1 %v1301_v2 }
 0x5cb   : > { %v1303_v50 = vpop.xlane.xlu1 %1302 }
 0x5cc   : > { %v1304_v1 = vmul.f32 %v1303_v50, %v3226_v17 }
 0x5ce   : > { %v1305_v51 = vadd.f32 1e-05, %v1304_v1 }
 0x5d0   : > { %2725 = vrsqrt.f32 %v1305_v51  ;;  %vm1312_vm8 = vweird.f32 %v1305_v51 }
 0x5d6   : > { %v2726_v52 = vpop.eup %2725 }
 0x5d7   : > { %v1307_v5 = vmul.f32 %v2726_v52, %v1305_v51  ;;  %vm1313_vm7 = vweird.f32 %v2726_v52  ;;  %v2848_v51 = vmov 0.0  }
 0x5d8   : > { %vm1314_vm9 = vmor %vm1312_vm8, %vm1313_vm7 }
 0x5d9   : > { %v1308_v53 = vmul.f32 %v2726_v52, %v1307_v5 }
 0x5db   : > { %v1309_v19 = vmul.f32 0.5, %v1308_v53 }
 0x5dd   : > { %v1310_v54 = vsub.f32 1.5, %v1309_v19 }
 0x5df   : > { %v1311_v55 = vmul.f32 %v2726_v52, %v1310_v54 }
 0x5e1   : > { %v1315_v57 = vsel %vm1314_vm9, %v2726_v52, %v1311_v55 }
 0x5e2   : > { %v1316_v22 = vmul.f32 %v1315_v57, %v1299_v21  ;;  %v3337_v57 = vld [vmem:[%s3886_s9 + $0xf8] sm:$0xff] }
 0x5e3   : > { %1559 = vmatpush.msra.mxu3 %v3337_v57 }
 0x5e4   : > { %v1318_v34 = vmul.f32 %v2702_v56, %v1316_v22  ;;  %v3332_v56 = vld [vmem:[%s3886_s9 + $0xf0] sm:$0xff]  ;;  %v3347_v22 = vld [vmem:[%s3886_s9 + $0xe0] sm:$0xff] }
 0x5e5   : > { %1539 = vmatpush.msrb.mxu2 %v3332_v56 }
 0x5e6   : > { %v3285_v59 = vadd.f32 %v2703_v58, %v1318_v34  ;;  %v1630_v58 = vld [vmem:[%s3890_s13 + $0x78] sm:$0xff]  ;;  %v3352_v34 = vld [vmem:[%s3886_s9 + $0xe8] sm:$0xff] }
 0x5e7   : > { %1631 = vmatpush.msra.mxu0 %v1630_v58  ;;  %1540 = vmatpush.msrb.mxu2 %v3347_v22  ;;  %v2447_v58 = vld [vmem:[%s3887_s10 + $0x30] sm:$0xf] }
 0x5e8   : > { %v3289_v60 = vpack.c.bf16 %v3285_v59, %v3285_v59  ;;  %1560 = vmatpush.msra.mxu3 %v3352_v34 }
 0x5e9   : > { %1632 = vmatpush.msra.mxu0 %v1629_v61  ;;  %v2605_v61 = vld [vmem:[%s3887_s10 + $0x34] sm:$0xf0] }
 0x5ea   : > { %2343 = vmatmul.msk.bf16.vlgmr.msra.gmra.mxu2 %vm524_vm0, %v3289_v60  ;;  %2344 = vmatmul.msk.bf16.vlgmr.msrb.gmra.mxu3 %vm524_vm0, %v3289_v60 }
 0x5eb   : > { %2363 = vmatmul.msk.bf16.vlgmr.msrb.gmra.mxu0 %vm524_vm0, %v3289_v60  ;;  %2364 = vmatmul.msk.bf16.vlgmr.msra.gmra.mxu1 %vm524_vm0, %v3289_v60 }
 0x668   : > { %v3302_v62 = vpop.f32.mrf.mxu0  ;;  %v3304_v39 = vpop.f32.mrf.mxu1 }
 0x66d   : > { %v1364_v3 = vpop.f32.mrf.mxu2  ;;  %v1377_v4 = vpop.f32.mrf.mxu3 }
 0x66e   : > { %v1365_v6 = vadd.f32 %v1364_v3, %v1328_v63  ;;  %v1378_v12 = vadd.f32 %v1377_v4, %v1329_v0  ;;  %v3360_v63 = vld [vmem:[%s3886_s9 + $0xd0] sm:$0xff]  ;;  %v3365_v0 = vld [vmem:[%s3886_s9 + $0xd8] sm:$0xff]  ;;  %v1628_v3 = vld [vmem:[%s3890_s13 + $0x68] sm:$0xff] }
 0x66f   : > { %v3375_v4 = vld [vmem:[%s3886_s9 + $0xc0] sm:$0xff]  ;;  %1541 = vmatpush.msrb.mxu2 %v3360_v63  ;;  %1561 = vmatpush.msra.mxu3 %v3365_v0 }
 0x670   : > { %v1522_v9 = vpop.f32.mrf.mxu0  ;;  %v1535_v7 = vpop.f32.mrf.mxu1  ;;  %1774 = vmax.xlane.f32.xlu2 %v1378_v12  ;;  %1414 = vmax.xlane.f32.xlu0 %v1365_v6 }
 0x671   : > { %1633 = vmatpush.msra.mxu0 %v1628_v3  ;;  %v3390_v9 = vld [vmem:[%s3886_s9 + $0xb0] sm:$0xff]  ;;  %v3395_v7 = vld [vmem:[%s3886_s9 + $0xb8] sm:$0xff]  ;;  %1542 = vmatpush.msrb.mxu2 %v3375_v4 }
 0x672   : > { %v2604_v3 = vld [vmem:[%s3887_s10 + $0x34] sm:$0xf] }
 0x673   : > { %1543 = vmatpush.msrb.mxu2 %v3390_v9 }
 0x675   : > { %v1366_v8 = vpop.f32.mrf.mxu2  ;;  %v1379_v10 = vpop.f32.mrf.mxu3 }
 0x676   : > { %v1626_v8 = vld [vmem:[%s3890_s13 + $0x58] sm:$0xff] }
 0x6e3   : > { %v1775_v11 = vpop.xlane.xlu2 %1774  ;;  %v1415_v13 = vpop.xlane.xlu0 %1414 }
 0x6e4   : > { %v1776_v14 = vsub.f32 %v1378_v12, %v1775_v11  ;;  %v1416_v15 = vsub.f32 %v1365_v6, %v1415_v13  ;;  %v3380_v6 = vld [vmem:[%s3886_s9 + $0xc8] sm:$0xff]  ;;  %v1627_v12 = vld [vmem:[%s3890_s13 + $0x60] sm:$0xff] }
 0x6e5   : > { %1562 = vmatpush.msra.mxu3 %v3380_v6  ;;  %1634 = vmatpush.msra.mxu0 %v1627_v12  ;;  %v2448_v12 = vor.u32 %v2605_v61, %v2447_v58 }
 0x6e6   : > { %v1777_v16 = vmul.f32 1.442695, %v1776_v14  ;;  %v1417_v18 = vmul.f32 1.442695, %v1416_v15 }
 0x6e7   : > { %1563 = vmatpush.msra.mxu3 %v3395_v7  ;;  %1635 = vmatpush.msra.mxu0 %v1626_v8  ;;  %v2449_v8 = vld [vmem:[%s3887_s10 + $0x38] sm:$0xf0] }
 0x6e8   : > { %2727 = vpow2.f32 %v1777_v16 }
 0x6e9   : > { %2729 = vpow2.f32 %v1417_v18 }
 0x6ee   : > { %v2728_v20 = vpop.eup %2727 }
 0x6ef   : > { %v2730_v21 = vpop.eup %2729  ;;  %1779 = vadd.xlane.f32.xlu2 %v2728_v20 }
 0x6f0   : > { %1419 = vadd.xlane.f32.xlu0 %v2730_v21 }
 0x762   : > { %v1780_v23 = vpop.xlane.xlu2 %1779 }
 0x763   : > { %2731 = vrcp.f32 %v1780_v23  ;;  %v1420_v2 = vpop.xlane.xlu0 %1419  ;;  %v1792_v29 = vand.u32 2147483648, %v1780_v23  ;;  %v1790_v32 = vand.u32 2147483647, %v1780_v23  ;;  %vm1786_vm12 = vweird.f32 %v1780_v23 }
 0x764   : > { %2733 = vrcp.f32 %v1420_v2  ;;  %v1432_v33 = vand.u32 2147483648, %v1420_v2  ;;  %v1430_v36 = vand.u32 2147483647, %v1420_v2  ;;  %vm1426_vm14 = vweird.f32 %v1420_v2 }
 0x765   : > { %v1793_v38 = vor.u32 1.1754944e-38, %v1792_v29  ;;  %vm1791_vm15 = vcmp.eq.f32.partialorder %v1790_v32, 8.507059e+37  ;;  %v1623_v29 = vld [vmem:[%s3890_s13 + $0x40] sm:$0xff]  ;;  %v1622_v32 = vld [vmem:[%s3890_s13 + $0x38] sm:$0xff] }
 0x766   : > { %v1433_v42 = vor.u32 1.1754944e-38, %v1432_v33  ;;  %vm1431_vm2 = vcmp.eq.f32.partialorder %v1430_v36, 8.507059e+37  ;;  %v3481_v33 = vld [vmem:[%s3886_s9 + $0x60] sm:$0xff]  ;;  %v1621_v36 = vld [vmem:[%s3890_s13 + $0x30] sm:$0xff] }
 0x769   : > { %v2732_v24 = vpop.eup %2731 }
 0x76a   : > { %v2734_v25 = vpop.eup %2733  ;;  %v1782_v26 = vmul.f32 %v2732_v24, %v1780_v23  ;;  %vm1787_vm10 = vweird.f32 %v2732_v24  ;;  %v3426_v23 = vld [vmem:[%s3886_s9 + $0xa8] sm:$0xff] }
 0x76b   : > { %v1422_v27 = vmul.f32 %v2734_v25, %v1420_v2  ;;  %vm1427_vm11 = vweird.f32 %v2734_v25  ;;  %vm1788_vm13 = vmor %vm1786_vm12, %vm1787_vm10  ;;  %v1625_v2 = vld [vmem:[%s3890_s13 + $0x50] sm:$0xff]  ;;  %1564 = vmatpush.msra.mxu3 %v3426_v23 }
 0x76c   : > { %v1783_v28 = vsub.f32 1.0, %v1782_v26  ;;  %vm1428_vm1 = vmor %vm1426_vm14, %vm1427_vm11  ;;  %1636 = vmatpush.msra.mxu0 %v1625_v2  ;;  %v1624_v26 = vld [vmem:[%s3890_s13 + $0x48] sm:$0xff] }
 0x76d   : > { %v1423_v30 = vsub.f32 1.0, %v1422_v27  ;;  %v3451_v27 = vld [vmem:[%s3886_s9 + $0x80] sm:$0xff]  ;;  %v2441_v2 = vld [vmem:[%s3887_s10 + $0x28] sm:$0xf0] }
 0x76e   : > { %v1784_v31 = vmul.f32 %v2732_v24, %v1783_v28  ;;  %1637 = vmatpush.msra.mxu0 %v1624_v26  ;;  %v3456_v28 = vld [vmem:[%s3886_s9 + $0x88] sm:$0xff] }
 0x76f   : > { %v1424_v35 = vmul.f32 %v2734_v25, %v1423_v30  ;;  %v3466_v30 = vld [vmem:[%s3886_s9 + $0x70] sm:$0xff] }
 0x770   : > { %v1785_v37 = vadd.f32 %v2732_v24, %v1784_v31  ;;  %1638 = vmatpush.msra.mxu0 %v1623_v29  ;;  %v3471_v31 = vld [vmem:[%s3886_s9 + $0x78] sm:$0xff] }
 0x771   : > { %v1425_v40 = vadd.f32 %v2734_v25, %v1424_v35  ;;  %v3486_v35 = vld [vmem:[%s3886_s9 + $0x68] sm:$0xff] }
 0x772   : > { %v1789_v41 = vsel %vm1788_vm13, %v2732_v24, %v1785_v37  ;;  %v3436_v24 = vld [vmem:[%s3886_s9 + $0x90] sm:$0xff]  ;;  %1639 = vmatpush.msra.mxu0 %v1622_v32 }
 0x773   : > { %v1794_v43 = vsel %vm1791_vm15, %v1793_v38, %v1789_v41  ;;  %v1429_v44 = vsel %vm1428_vm1, %v2734_v25, %v1425_v40  ;;  %v3441_v25 = vld [vmem:[%s3886_s9 + $0x98] sm:$0xff]  ;;  %v3496_v37 = vld [vmem:[%s3886_s9 + $0x50] sm:$0xff]  ;;  %v1620_v40 = vld [vmem:[%s3890_s13 + $0x28] sm:$0xff] }
 0x774   : > { %v1434_v45 = vsel %vm1431_vm2, %v1433_v42, %v1429_v44  ;;  %v3310_v46 = vmul.f32 %v2728_v20, %v1794_v43  ;;  %1565 = vmatpush.msra.mxu3 %v3441_v25  ;;  %1640 = vmatpush.msra.mxu0 %v1621_v36  ;;  %v3501_v38 = vld [vmem:[%s3886_s9 + $0x58] sm:$0xff]  ;;  %v3511_v41 = vld [vmem:[%s3886_s9 + $0x40] sm:$0xff]  ;;  %v3516_v42 = vld [vmem:[%s3886_s9 + $0x48] sm:$0xff] }
 0x775   : > { %v1435_v47 = vmul.f32 %v2730_v21, %v1434_v45  ;;  %v3421_v21 = vld [vmem:[%s3886_s9 + $0xa0] sm:$0xff]  ;;  %v3526_v44 = vld [vmem:[%s3886_s9 + $0x30] sm:$0xff]  ;;  %v3531_v45 = vld [vmem:[%s3886_s9 + $0x38] sm:$0xff] }
 0x776   : > { %1798 = vmax.xlane.f32.xlu2 %v3310_v46  ;;  %2429 = vst [vmem:[%s3313_s0 + $0x8] sm:$0xff] %v3310_v46  ;;  %1544 = vmatpush.msrb.mxu2 %v3421_v21  ;;  %v1619_v43 = vld [vmem:[%s3890_s13 + $0x20] sm:$0xff] }
 0x777   : > { %1437 = vmax.xlane.f32.xlu0 %v1435_v47  ;;  %1436 = vst [vmem:[%s3313_s0] sm:$0xff] %v1435_v47  ;;  %1566 = vmatpush.msra.mxu3 %v3456_v28 }
 0x778   : > { %1545 = vmatpush.msrb.mxu2 %v3436_v24  ;;  %1641 = vmatpush.msra.mxu0 %v1620_v40 }
 0x779   : > { %1567 = vmatpush.msra.mxu3 %v3471_v31 }
 0x77a   : > { %1546 = vmatpush.msrb.mxu2 %v3451_v27  ;;  %1642 = vmatpush.msra.mxu0 %v1619_v43 }
 0x77b   : > { %1568 = vmatpush.msra.mxu3 %v3486_v35 }
 0x77c   : > { %1547 = vmatpush.msrb.mxu2 %v3466_v30 }
 0x77d   : > { %1569 = vmatpush.msra.mxu3 %v3501_v38 }
 0x77e   : > { %1548 = vmatpush.msrb.mxu2 %v3481_v33 }
 0x77f   : > { %1570 = vmatpush.msra.mxu3 %v3516_v42 }
 0x780   : > { %1549 = vmatpush.msrb.mxu2 %v3496_v37 }
 0x781   : > { %1571 = vmatpush.msra.mxu3 %v3531_v45 }
 0x782   : > { %1550 = vmatpush.msrb.mxu2 %v3511_v41 }
 0x784   : > { %1551 = vmatpush.msrb.mxu2 %v3526_v44 }
 0x7e9   : > { %v1799_v54 = vpop.xlane.xlu2 %1798 }
 0x7ea   : > { %v1438_v49 = vpop.xlane.xlu0 %1437  ;;  %vm1800_vm7 = vcmp.eq.f32.partialorder %v3310_v46, %v1799_v54  ;;  %v3574_v54 = vld [vmem:[%s3886_s9 + $0x8] sm:$0xff] }
 0x7eb   : > { %vm1439_vm3 = vcmp.eq.f32.partialorder %v1435_v47, %v1438_v49  ;;  %v1801_v55 = vsel %vm1800_vm7, %v3321_v48, 128.0  ;;  %v3541_v49 = vld [vmem:[%s3886_s9 + $0x20] sm:$0xff] }
 0x7ec   : > { %v1443_v50 = vsel %vm1439_vm3, %v3321_v48, 128.0  ;;  %1552 = vmatpush.msrb.mxu2 %v3541_v49 }
 0x7ed   : > { %1444 = vmin.xlane.f32.xlu0 %v1443_v50  ;;  %v3546_v50 = vld [vmem:[%s3886_s9 + $0x28] sm:$0xff] }
 0x7ee   : > { %1572 = vmatpush.msra.mxu3 %v3546_v50 }
 0x860   : > { %v1445_v1 = vpop.xlane.xlu0 %1444 }
 0x861   : > { %vm1446_vm4 = vcmp.eq.f32.partialorder %v3321_v48, %v1445_v1  ;;  %v1617_v1 = vld [vmem:[%s3890_s13 + $0x10] sm:$0xff] }
 0x862   : > { %v2345_v52 = vsel %vm1446_vm4, 1.0, %v2848_v51 }
 0x863   : > { %vm1450_vm5 = vcmp.gt.f32.partialorder %v2345_v52, 0.0  ;;  %v1449_v11 = vmax.f32 %v2345_v52, 0.0  ;;  %v3554_v52 = vld [vmem:[%s3886_s9 + $0x10] sm:$0xff] }
 0x864   : > { %v1451_v5 = vsel %vm1450_vm5, -1.0, %v1435_v47  ;;  %1553 = vmatpush.msrb.mxu2 %v3554_v52 }
 0x865   : > { %1452 = vmax.xlane.f32.xlu1 %v1451_v5 }
 0x8d8   : > { %v1453_v53 = vpop.xlane.xlu1 %1452 }
 0x8d9   : > { %vm1454_vm6 = vcmp.eq.f32.partialorder %v1451_v5, %v1453_v53  ;;  %v3559_v5 = vld [vmem:[%s3886_s9 + $0x18] sm:$0xff]  ;;  %v1616_v53 = vld [vmem:[%s3890_s13 + $0x8] sm:$0xff] }
 0x8da   : > { %v1455_v19 = vsel %vm1454_vm6, %v3321_v48, 128.0  ;;  %1573 = vmatpush.msra.mxu3 %v3559_v5 }
 0x8db   : > { %1456 = vmin.xlane.f32.xlu0 %v1455_v19  ;;  %v3569_v19 = vld [vmem:[%s3886_s9] sm:$0xff] }
 0x8dc   : > { %1554 = vmatpush.msrb.mxu2 %v3569_v19  ;;  %1574 = vmatpush.msra.mxu3 %v3574_v54 }
 0x8de   : > { %1877 = vmatpush.bf16.msrb.mxu3 %v2448_v12 }
 0x8e3   : > { %1802 = vmin.xlane.f32.xlu0 %v1801_v55  ;;  %v1615_v55 = vld [vmem:[%s3890_s13] sm:$0xff] }
 0x94e   : > { %v1457_v10 = vpop.xlane.xlu0 %1456 }
 0x94f   : > { %vm1458_vm8 = vcmp.eq.f32.partialorder %v3321_v48, %v1457_v10  ;;  %v2452_v10 = vor.u32 %v2604_v3, %v2449_v8 }
 0x950   : > { %v2346_v13 = vsel %vm1458_vm8, 1.0, %v2848_v51 }
 0x951   : > { %v1461_v14 = vmax.f32 %v1449_v11, %v2346_v13  ;;  %v2439_v11 = vld [vmem:[%s3887_s10 + $0x20] sm:$0xf]  ;;  %v2603_v13 = vld [vmem:[%s3887_s10 + $0x24] sm:$0xf0] }
 0x953   : > { %v3406_v15 = vmul.f32 %v1461_v14, %v1435_v47  ;;  %v1618_v47 = vld [vmem:[%s3890_s13 + $0x18] sm:$0xff]  ;;  %v2602_v14 = vld [vmem:[%s3887_s10 + $0x24] sm:$0xf] }
 0x954   : > { %1643 = vmatpush.msra.mxu0 %v1618_v47  ;;  %v2444_v26 = vor.u32 %v2602_v14, %v2441_v2 }
 0x955   : > { %1463 = vadd.xlane.f32.xlu1 %v3406_v15 }
 0x956   : > { %v1803_v16 = vpop.xlane.xlu0 %1802  ;;  %1644 = vmatpush.msra.mxu0 %v1617_v1 }
 0x957   : > { %vm1804_vm9 = vcmp.eq.f32.partialorder %v3321_v48, %v1803_v16  ;;  %v2440_v16 = vor.u32 %v2603_v13, %v2439_v11 }
 0x958   : > { %v3411_v18 = vsel %vm1804_vm9, 1.0, %v2848_v51  ;;  %1645 = vmatpush.msra.mxu0 %v1616_v53 }
 0x959   : > { %vm1808_vm10 = vcmp.gt.f32.partialorder %v3411_v18, 0.0  ;;  %1878 = vmatpush.bf16.msrb.mxu3 %v2440_v16 }
 0x95a   : > { %v3415_v20 = vsel %vm1808_vm10, -1.0, %v3310_v46  ;;  %1646 = vmatpush.msra.mxu0 %v1615_v55 }
 0x95b   : > { %1810 = vmax.xlane.f32.xlu2 %v3415_v20 }
 0x95c   : > { %1890 = vmatpush.bf16.msrb.mxu0 %v2452_v10 }
 0x960   : > { %1891 = vmatpush.bf16.msrb.mxu0 %v2444_v26  ;;  %v2497_v26 = vld [vmem:[%s3890_s13 + $0xd0] sm:$0xff] }
 0x9c8   : > { %v1464_v29 = vpop.xlane.xlu1 %1463 }
 0x9c9   : > { %2735 = vrcp.f32 %v1464_v29  ;;  %v1476_v1 = vand.u32 2147483648, %v1464_v29  ;;  %v1474_v55 = vand.u32 2147483647, %v1464_v29  ;;  %vm1470_vm13 = vweird.f32 %v1464_v29 }
 0x9cb   : > { %v1477_v61 = vor.u32 1.1754944e-38, %v1476_v1  ;;  %vm1475_vm15 = vcmp.eq.f32.partialorder %v1474_v55, 8.507059e+37  ;;  %v2488_v1 = vld [vmem:[%s3890_s13 + $0x88] sm:$0xff] }
 0x9ce   : > { %v1811_v32 = vpop.xlane.xlu2 %1810 }
 0x9cf   : > { %v2736_v36 = vpop.eup %2735  ;;  %vm1812_vm11 = vcmp.eq.f32.partialorder %v3415_v20, %v1811_v32  ;;  %v2598_v20 = vld [vmem:[%s3889_s12 + $0x60] sm:$0xff]  ;;  %v2493_v32 = vld [vmem:[%s3890_s13 + $0xb0] sm:$0xff] }
 0x9d0   : > { %v1466_v40 = vmul.f32 %v2736_v36, %v1464_v29  ;;  %v1813_v43 = vsel %vm1812_vm11, %v3321_v48, 128.0  ;;  %vm1471_vm12 = vweird.f32 %v2736_v36  ;;  %v2494_v29 = vld [vmem:[%s3890_s13 + $0xb8] sm:$0xff] }
 0x9d1   : > { %1814 = vmin.xlane.f32.xlu1 %v1813_v43  ;;  %vm1472_vm14 = vmor %vm1470_vm13, %vm1471_vm12  ;;  %v2490_v43 = vld [vmem:[%s3890_s13 + $0x98] sm:$0xff] }
 0x9d2   : > { %v1467_v47 = vsub.f32 1.0, %v1466_v40  ;;  %v2491_v40 = vld [vmem:[%s3890_s13 + $0xa0] sm:$0xff] }
 0x9d4   : > { %v1468_v53 = vmul.f32 %v2736_v36, %v1467_v47  ;;  %v2489_v47 = vld [vmem:[%s3890_s13 + $0x90] sm:$0xff] }
 0x9d6   : > { %v1469_v58 = vadd.f32 %v2736_v36, %v1468_v53  ;;  %v2487_v53 = vld [vmem:[%s3890_s13 + $0x80] sm:$0xff] }
 0x9d8   : > { %v1473_v3 = vsel %vm1472_vm14, %v2736_v36, %v1469_v58  ;;  %v2492_v36 = vld [vmem:[%s3890_s13 + $0xa8] sm:$0xff] }
 0x9d9   : > { %v1478_v12 = vsel %vm1475_vm15, %v1477_v61, %v1473_v3 }
 0x9da   : > { %v1479_v8 = vmul.f32 %v1478_v12, %v3406_v15  ;;  %v2590_v15 = vld [vmem:[%s3889_s12 + $0x20] sm:$0xff] }
 0x9dc   : > { %v1480_v10 = vmul.f32 0.5, %v1479_v8 }
 0x9de   : > { %1555 = vmatmul.f32.vlgmr.msrb.gmra.mxu2 %v1480_v10  ;;  %1575 = vmatmul.f32.vlgmr.msra.gmra.mxu3 %v1480_v10 }
 0x9df   : > { %1647 = vmatmul.f32.vlgmr.msra.gmra.mxu0 %v1480_v10  ;;  %1899 = vmatpush.msra.mxu3 %v3332_v56  ;;  %v2601_v56 = vld [vmem:[%s3889_s12 + $0x78] sm:$0xff] }
 0x9e0   : > { %1760 = vmatpush.bf16.msra.mxu2 %v2601_v56 }
 0x9e1   : > { %1900 = vmatpush.msra.mxu3 %v3347_v22  ;;  %v2592_v22 = vld [vmem:[%s3889_s12 + $0x30] sm:$0xff] }
 0x9e3   : > { %1901 = vmatpush.msra.mxu3 %v3360_v63  ;;  %v2600_v63 = vld [vmem:[%s3889_s12 + $0x70] sm:$0xff] }
 0x9e4   : > { %1761 = vmatpush.bf16.msra.mxu2 %v2600_v63 }
 0x9e5   : > { %1902 = vmatpush.msra.mxu3 %v3375_v4  ;;  %v2591_v4 = vld [vmem:[%s3889_s12 + $0x28] sm:$0xff] }
 0x9e6   : > { %2453 = vmatmul.msk.bf16.vlgmr.msrb.gmra.mxu3 %vm524_vm0, %v3289_v60 }
 0x9e7   : > { %2454 = vmatmul.msk.bf16.vlgmr.msrb.gmra.mxu0 %vm524_vm0, %v3289_v60  ;;  %1903 = vmatpush.msra.mxu3 %v3390_v9  ;;  %v2593_v60 = vld [vmem:[%s3889_s12 + $0x38] sm:$0xff]  ;;  %v2599_v9 = vld [vmem:[%s3889_s12 + $0x68] sm:$0xff] }
 0x9e8   : > { %1747 = vmatpush.bf16.msrb.mxu1 %v2593_v60  ;;  %1762 = vmatpush.bf16.msra.mxu2 %v2599_v9  ;;  %v2621_v9 = vld [vmem:[%s3889_s12 + $0xf8] sm:$0xff] }
 0x9e9   : > { %1904 = vmatpush.msra.mxu3 %v3421_v21  ;;  %v2589_v21 = vld [vmem:[%s3889_s12 + $0x18] sm:$0xff] }
 0x9eb   : > { %1905 = vmatpush.msra.mxu3 %v3436_v24  ;;  %v2597_v24 = vld [vmem:[%s3889_s12 + $0x58] sm:$0xff] }
 0x9ec   : > { %1748 = vmatpush.bf16.msrb.mxu1 %v2592_v22  ;;  %1763 = vmatpush.bf16.msra.mxu2 %v2598_v20 }
 0x9ed   : > { %1906 = vmatpush.msra.mxu3 %v3451_v27  ;;  %v2588_v27 = vld [vmem:[%s3889_s12 + $0x10] sm:$0xff] }
 0x9ef   : > { %1907 = vmatpush.msra.mxu3 %v3466_v30  ;;  %v2596_v30 = vld [vmem:[%s3889_s12 + $0x50] sm:$0xff] }
 0x9f0   : > { %1749 = vmatpush.bf16.msrb.mxu1 %v2591_v4  ;;  %1764 = vmatpush.bf16.msra.mxu2 %v2597_v24  ;;  %v2612_v24 = vld [vmem:[%s3889_s12 + $0xb0] sm:$0xff] }
 0x9f1   : > { %1908 = vmatpush.msra.mxu3 %v3481_v33  ;;  %v2587_v33 = vld [vmem:[%s3889_s12 + $0x8] sm:$0xff] }
 0x9f3   : > { %1909 = vmatpush.msra.mxu3 %v3496_v37  ;;  %v2595_v37 = vld [vmem:[%s3889_s12 + $0x48] sm:$0xff] }
 0x9f4   : > { %1750 = vmatpush.bf16.msrb.mxu1 %v2590_v15  ;;  %1765 = vmatpush.bf16.msra.mxu2 %v2596_v30  ;;  %v2613_v15 = vld [vmem:[%s3889_s12 + $0xb8] sm:$0xff]  ;;  %v2611_v30 = vld [vmem:[%s3889_s12 + $0xa8] sm:$0xff] }
 0x9f5   : > { %1910 = vmatpush.msra.mxu3 %v3511_v41  ;;  %v2586_v41 = vld [vmem:[%s3889_s12] sm:$0xff] }
 0x9f7   : > { %1911 = vmatpush.msra.mxu3 %v3526_v44  ;;  %v2594_v44 = vld [vmem:[%s3889_s12 + $0x40] sm:$0xff] }
 0x9f8   : > { %1751 = vmatpush.bf16.msrb.mxu1 %v2589_v21  ;;  %1766 = vmatpush.bf16.msra.mxu2 %v2595_v37  ;;  %v2620_v21 = vld [vmem:[%s3889_s12 + $0xf0] sm:$0xff]  ;;  %v2610_v37 = vld [vmem:[%s3889_s12 + $0xa0] sm:$0xff] }
 0x9f9   : > { %1912 = vmatpush.msra.mxu3 %v3541_v49 }
 0x9fb   : > { %1913 = vmatpush.msra.mxu3 %v3554_v52  ;;  %v1807_v52 = vmax.f32 %v3411_v18, 0.0 }
 0x9fc   : > { %1752 = vmatpush.bf16.msrb.mxu1 %v2588_v27  ;;  %1767 = vmatpush.bf16.msra.mxu2 %v2594_v44  ;;  %v2619_v27 = vld [vmem:[%s3889_s12 + $0xe8] sm:$0xff]  ;;  %v2609_v44 = vld [vmem:[%s3889_s12 + $0x98] sm:$0xff] }
 0x9fd   : > { %1914 = vmatpush.msra.mxu3 %v3569_v19 }
 0x9ff   : > { %2122 = vmatpush.bf16.msrb.mxu3 %v2621_v9 }
 0xa00   : > { %1753 = vmatpush.bf16.msrb.mxu1 %v2587_v33  ;;  %2109 = vmatpush.bf16.msrb.mxu2 %v2613_v15  ;;  %v2618_v33 = vld [vmem:[%s3889_s12 + $0xe0] sm:$0xff] }
 0xa03   : > { %2123 = vmatpush.bf16.msrb.mxu3 %v2620_v21 }
 0xa04   : > { %1754 = vmatpush.bf16.msrb.mxu1 %v2586_v41  ;;  %2110 = vmatpush.bf16.msrb.mxu2 %v2612_v24  ;;  %v2617_v41 = vld [vmem:[%s3889_s12 + $0xd8] sm:$0xff] }
 0xa07   : > { %2124 = vmatpush.bf16.msrb.mxu3 %v2619_v27 }
 0xa08   : > { %1919 = vmatpush.msra.mxu1 %v3337_v57  ;;  %v1485_v57 = vld [vmem:[%s3888_s11] sm:$0x3]  ;;  %2111 = vmatpush.bf16.msrb.mxu2 %v2611_v30 }
 0xa0a   : > { %1920 = vmatpush.msra.mxu1 %v3352_v34  ;;  %v2499_v34 = vld [vmem:[%s3890_s13 + $0xe0] sm:$0xff] }
 0xa0b   : > { %2125 = vmatpush.bf16.msrb.mxu3 %v2618_v33 }
 0xa0c   : > { %1921 = vmatpush.msra.mxu1 %v3365_v0  ;;  %v2498_v0 = vld [vmem:[%s3890_s13 + $0xd8] sm:$0xff]  ;;  %2112 = vmatpush.bf16.msrb.mxu2 %v2610_v37 }
 0xa0e   : > { %1922 = vmatpush.msra.mxu1 %v3380_v6  ;;  %v1487_v6 = vperm.slane %v1485_v57, 0 }
 0xa0f   : > { %2126 = vmatpush.bf16.msrb.mxu3 %v2617_v41 }
 0xa10   : > { %1923 = vmatpush.msra.mxu1 %v3395_v7  ;;  %v1488_v7 = vperm.slane %v1485_v57, 1  ;;  %v1521_v18 = vadd.f32 %v3302_v62, %v1487_v6  ;;  %2113 = vmatpush.bf16.msrb.mxu2 %v2609_v44  ;;  %v2608_v57 = vld [vmem:[%s3889_s12 + $0x90] sm:$0xff]  ;;  %v2606_v6 = vld [vmem:[%s3889_s12 + $0x80] sm:$0xff] }
 0xa12   : > { %1924 = vmatpush.msra.mxu1 %v3426_v23  ;;  %v1534_v23 = vadd.f32 %v3304_v39, %v1488_v7  ;;  %v2436_v7 = vld [vmem:[%s3888_s11 + $0x2] sm:$0x3] }
 0xa14   : > { %1925 = vmatpush.msra.mxu1 %v3441_v25  ;;  %2114 = vmatpush.bf16.msrb.mxu2 %v2608_v57 }
 0xa16   : > { %1926 = vmatpush.msra.mxu1 %v3456_v28  ;;  %v1537_v28 = vmax.f32 %v1521_v18, 0.0  ;;  %v1848_v18 = vperm.slane %v2436_v7, 1 }
 0xa18   : > { %1927 = vmatpush.msra.mxu1 %v3471_v31  ;;  %v1538_v31 = vmax.f32 %v1534_v23, 0.0 }
 0xa1a   : > { %1928 = vmatpush.msra.mxu1 %v3486_v35 }
 0xa1c   : > { %1929 = vmatpush.msra.mxu1 %v3501_v38 }
 0xa1e   : > { %1930 = vmatpush.msra.mxu1 %v3516_v42 }
 0xa20   : > { %1931 = vmatpush.msra.mxu1 %v3531_v45 }
 0xa22   : > { %1932 = vmatpush.msra.mxu1 %v3546_v50 }
 0xa24   : > { %1933 = vmatpush.msra.mxu1 %v3559_v5  ;;  %v2496_v5 = vld [vmem:[%s3890_s13 + $0xc8] sm:$0xff] }
 0xa26   : > { %1934 = vmatpush.msra.mxu1 %v3574_v54  ;;  %v2495_v54 = vld [vmem:[%s3890_s13 + $0xc0] sm:$0xff] }
 0xa44   : > { %v1815_v49 = vpop.xlane.xlu1 %1814 }
 0xa45   : > { %vm1816_vm1 = vcmp.eq.f32.partialorder %v3321_v48, %v1815_v49  ;;  %v2502_v48 = vld [vmem:[%s3890_s13 + $0xf8] sm:$0xff] }
 0xa46   : > { %v2431_v19 = vsel %vm1816_vm1, 1.0, %v2848_v51  ;;  %v2501_v51 = vld [vmem:[%s3890_s13 + $0xf0] sm:$0xff]  ;;  %1993 = vmatpush.msra.mxu0 %v2502_v48 }
 0xa47   : > { %v1819_v11 = vmax.f32 %v1807_v52, %v2431_v19  ;;  %v2616_v52 = vld [vmem:[%s3889_s12 + $0xd0] sm:$0xff]  ;;  %v2615_v19 = vld [vmem:[%s3889_s12 + $0xc8] sm:$0xff] }
 0xa48   : > { %1994 = vmatpush.msra.mxu0 %v2501_v51  ;;  %2127 = vmatpush.bf16.msrb.mxu3 %v2616_v52 }
 0xa49   : > { %v3684_v13 = vmul.f32 %v1819_v11, %v3310_v46  ;;  %v2500_v46 = vld [vmem:[%s3890_s13 + $0xe8] sm:$0xff] }
 0xa4a   : > { %1995 = vmatpush.msra.mxu0 %v2500_v46 }
 0xa4b   : > { %1821 = vadd.xlane.f32.xlu0 %v3684_v13 }
 0xa4c   : > { %1996 = vmatpush.msra.mxu0 %v2499_v34  ;;  %2128 = vmatpush.bf16.msrb.mxu3 %v2615_v19  ;;  %v2614_v34 = vld [vmem:[%s3889_s12 + $0xc0] sm:$0xff] }
 0xa4e   : > { %1997 = vmatpush.msra.mxu0 %v2498_v0  ;;  %v2607_v0 = vld [vmem:[%s3889_s12 + $0x88] sm:$0xff] }
 0xa4f   : > { %2115 = vmatpush.bf16.msrb.mxu2 %v2607_v0 }
 0xa50   : > { %1998 = vmatpush.msra.mxu0 %v2497_v26  ;;  %2129 = vmatpush.bf16.msrb.mxu3 %v2614_v34 }
 0xa52   : > { %1999 = vmatpush.msra.mxu0 %v2496_v5 }
 0xa53   : > { %2116 = vmatpush.bf16.msrb.mxu2 %v2606_v6 }
 0xa54   : > { %2000 = vmatpush.msra.mxu0 %v2495_v54 }
 0xa56   : > { %2001 = vmatpush.msra.mxu0 %v2494_v29 }
 0xa58   : > { %2002 = vmatpush.msra.mxu0 %v2493_v32 }
 0xa5a   : > { %2003 = vmatpush.msra.mxu0 %v2492_v36 }
 0xa5c   : > { %v3717_v25 = vpop.f32.mrf.mxu0  ;;  %2004 = vmatpush.msra.mxu0 %v2491_v40 }
 0xa5e   : > { %2005 = vmatpush.msra.mxu0 %v2490_v43 }
 0xa60   : > { %2006 = vmatpush.msra.mxu0 %v2489_v47 }
 0xa61   : > { %v1556_v35 = vpop.f32.mrf.mxu2  ;;  %v1576_v14 = vpop.f32.mrf.mxu3 }
 0xa62   : > { %v1579_v38 = vmul.f32 %v1556_v35, %v1537_v28  ;;  %v1580_v16 = vmul.f32 %v1576_v14, %v1538_v31  ;;  %2007 = vmatpush.msra.mxu0 %v2488_v1 }
 0xa64   : > { %v1581_v42 = vpack.c.bf16 %v1579_v38, %v1579_v38  ;;  %v1582_v62 = vpack.c.bf16 %v1580_v16, %v1580_v16  ;;  %v3723_v2 = vpop.f32.mrf.mxu0  ;;  %2008 = vmatpush.msra.mxu0 %v2487_v53 }
 0xa65   : > { %v1894_v23 = vadd.f32 %v3723_v2, %v1848_v18 }
 0xa66   : > { %1755 = vmatmul.bf16.vlgmr.msrb.gmra.mxu1 %v1581_v42  ;;  %1768 = vmatmul.bf16.vlgmr.msra.gmra.mxu2 %v1582_v62 }
 0xa67   : > { %v1898_v28 = vmax.f32 %v1894_v23, 0.0 }
 0xa69   : > { %v3725_v39 = vpop.f32.mrf.mxu3 }
 0xa6c   : > { %v1895_v45 = vpop.f32.mrf.mxu0 }
 0xa71   : > { %v1882_v50 = vpop.f32.mrf.mxu3 }
 0xabe   : > { %v1822_v55 = vpop.xlane.xlu0 %1821 }
 0xabf   : > { %2737 = vrcp.f32 %v1822_v55  ;;  %v1834_v12 = vand.u32 2147483648, %v1822_v55  ;;  %v1832_v10 = vand.u32 2147483647, %v1822_v55  ;;  %vm1828_vm3 = vweird.f32 %v1822_v55 }
 0xac1   : > { %v1835_v56 = vor.u32 1.1754944e-38, %v1834_v12  ;;  %vm1833_vm5 = vcmp.eq.f32.partialorder %v1832_v10, 8.507059e+37 }
 0xac5   : > { %v2738_v58 = vpop.eup %2737 }
 0xac6   : > { %v1824_v61 = vmul.f32 %v2738_v58, %v1822_v55  ;;  %vm1829_vm2 = vweird.f32 %v2738_v58 }
 0xac7   : > { %vm1830_vm4 = vmor %vm1828_vm3, %vm1829_vm2 }
 0xac8   : > { %v1825_v3 = vsub.f32 1.0, %v1824_v61 }
 0xaca   : > { %v1826_v8 = vmul.f32 %v2738_v58, %v1825_v3 }
 0xacc   : > { %v1827_v60 = vadd.f32 %v2738_v58, %v1826_v8 }
 0xace   : > { %v1831_v22 = vsel %vm1830_vm4, %v2738_v58, %v1827_v60 }
 0xacf   : > { %v1836_v63 = vsel %vm1833_vm5, %v1835_v56, %v1831_v22 }
 0xad0   : > { %v1837_v4 = vmul.f32 %v1836_v63, %v3684_v13 }
 0xad2   : > { %v1838_v20 = vmul.f32 0.5, %v1837_v4 }
 0xad4   : > { %1915 = vmatmul.f32.vlgmr.msra.gmra.mxu3 %v1838_v20  ;;  %1935 = vmatmul.f32.vlgmr.msra.gmra.mxu1 %v1838_v20 }
 0xad5   : > { %2009 = vmatmul.f32.vlgmr.msra.gmra.mxu0 %v1838_v20 }
 0xae3   : > { %v1756_v49 = vpop.f32.mrf.mxu1 }
 0xae4   : > { %v1757_v11 = vadd.f32 %v1756_v49, %v3717_v25  ;;  %v1847_v25 = vperm.slane %v2436_v7, 0 }
 0xae6   : > { %v1881_v35 = vadd.f32 %v3725_v39, %v1847_v25 }
 0xae8   : > { %v1897_v16 = vmax.f32 %v1881_v35, 0.0 }
 0xae9   : > { %v1769_v13 = vpop.f32.mrf.mxu2 }
 0xaea   : > { %v1770_v48 = vadd.f32 %v1769_v13, %v1757_v11 }
 0xaeb   : > { %v1758_v51 = vpop.f32.mrf.mxu1 }
 0xaf1   : > { %v1771_v46 = vpop.f32.mrf.mxu2 }
 0xb51   : > { %v1936_v31 = vpop.f32.mrf.mxu1 }
 0xb52   : > { %v1940_v14 = vmul.f32 %v1936_v31, %v1898_v28  ;;  %v2010_v26 = vpop.f32.mrf.mxu0 }
 0xb54   : > { %v1942_v38 = vpack.c.bf16 %v1940_v14, %v1940_v14 }
 0xb56   : > { %2130 = vmatmul.bf16.vlgmr.msrb.gmra.mxu3 %v1942_v38 }
 0xb57   : > { %v1916_v42 = vpop.f32.mrf.mxu3 }
 0xb58   : > { %v1939_v62 = vmul.f32 %v1916_v42, %v1897_v16 }
 0xb5a   : > { %v1941_v45 = vpack.c.bf16 %v1939_v62, %v1939_v62 }
 0xb5c   : > { %2117 = vmatmul.bf16.vlgmr.msrb.gmra.mxu2 %v1941_v45 }
 0xbd9   : > { %v2131_v50 = vpop.f32.mrf.mxu3 }
 0xbdf   : > { %v2118_v5 = vpop.f32.mrf.mxu2 }
 0xbe0   : > { %v2119_v54 = vadd.f32 %v2118_v5, %v2010_v26 }
 0xbe1   : > { %v2133_v2 = vpop.f32.mrf.mxu3 }
 0xbe2   : > { %v2132_v29 = vadd.f32 %v2131_v50, %v2119_v54 }
 0xbe4   : > { %v2135_v32 = vadd.f32 %v2132_v29, %v1770_v48 }
 0xbe6   : > { %v2136_v36 = vadd.f32 %v2135_v32, %v3285_v59 }
 0xbe7   : > { %v2120_v39 = vpop.f32.mrf.mxu2 }
 0xbe8   : > { %v2137_v40 = vsel %vm524_vm0, %v2136_v36, 0.0 }
 0xbe9   : > { %2138 = vadd.xlane.f32.xlu2 %v2137_v40 }
 0xc5c   : > { %v2139_v43 = vpop.xlane.xlu2 %2138 }
 0xc5d   : > { %v2140_v47 = vmul.f32 %v2139_v43, %v3226_v17 }
 0xc5f   : > { %v2141_v1 = vsub.f32 %v2136_v36, %v2140_v47 }
 0xc61   : > { %v2142_v53 = vmul.f32 %v2141_v1, %v2141_v1 }
 0xc63   : > { %v2143_v55 = vsel %vm524_vm0, %v2142_v53, 0.0 }
 0xc64   : > { %2144 = vadd.xlane.f32.xlu1 %v2143_v55 }
 0xc65   : > { %2768 = shalt.err (!%p2765_p3)
}
 0xc66   : > { %s2849_s0 = smov 128   ;;  %s3916_s2 = smov 8   ;;  %v2705_v22 = vld [vmem:[%s3881_s4 + $0x3] ss:$0 sm:$0xff]  ;;  %v2706_v4 = vld [vmem:[%s3881_s4 + $0x4] ss:$0 sm:$0xff] }
 0xc67   : > { %2624 = dma.vmem_to_hbm [thread:$0]  (%p2968_p5), %s2197_s25, 256, %s2199_s16, %s2170_s1, %s2849_s0, %s2849_s0, %s3916_s2  }
 0xc68   : > { %s2298_s3 = sshll.u32 %s3307_s27, 3  ;;  %s2569_s5 = sshll.u32 %s2951_s22, 3 }
 0xc69   : > { %s2180_s24 = scalar_lea.hbm %s3891_s14, %s2569_s5  ;;  %s489_s22 = scalar_lea.vmem [#allocation2], %s2298_s3 }
 0xc6a   : > { %s2182_s1 = sshll.u32 %s489_s22, 4  ;;  %s2184_s26 = sshll.u32 %s2180_s24, 4  ;;  %s2183_s1 = int_to_ptr.vmem [resolvable:$true] %s2182_s1  ;;  %s2185_s26 = int_to_ptr.hbm [resolvable:$true] %s2184_s26 }
 0xc6b   : > { %s2165_s30 = scalar_lea.sflag [#allocation3], %s3307_s27  ;;  %s2783_s17 = sshra.s32 %s2185_s26, 4  ;;  %s2784_s17 = int_to_ptr.hbm [resolvable:$true] %s2783_s17 }
 0xc6c   : > { %s2785_s0 = scalar_lea.hbm %s2784_s17, 8  ;;  %s2789_s3 = scalar_lea.hbm %s3891_s14, 16 }
 0xc6d   : > { %p2786_p4 = scmp.ne.s32.totalorder %s2784_s17, %s2785_s0  ;;  %p2790_p9 = scmp.lt.s32.totalorder %s2784_s17, %s3891_s14 }
 0xc6e   : > { %p2791_p10 = scmp.lt.s32.totalorder %s2789_s3, %s2785_s0 }
 0xc6f   : > { %p2787_p7 = pnand %p2786_p4, %p2968_p5 }
 0xc70   : > { %p2792_p11 = por %p2791_p10, %p2790_p9 }
 0xc71   : > { %p2788_p8 = pneg %p2787_p7 }
 0xc73   : > { %p2793_p12 = pnand %p2792_p11, %p2788_p8 }
 0xcd7   : > { %v2145_v59 = vpop.xlane.xlu1 %2144 }
 0xcd8   : > { %v2146_v58 = vmul.f32 %v2145_v59, %v3226_v17 }
 0xcda   : > { %v2147_v61 = vadd.f32 1e-05, %v2146_v58 }
 0xcdc   : > { %2739 = vrsqrt.f32 %v2147_v61  ;;  %vm2154_vm7 = vweird.f32 %v2147_v61 }
 0xce2   : > { %v2740_v3 = vpop.eup %2739 }
 0xce3   : > { %v2149_v12 = vmul.f32 %v2740_v3, %v2147_v61  ;;  %vm2155_vm6 = vweird.f32 %v2740_v3 }
 0xce4   : > { %vm2156_vm8 = vmor %vm2154_vm7, %vm2155_vm6 }
 0xce5   : > { %v2150_v8 = vmul.f32 %v2740_v3, %v2149_v12 }
 0xce7   : > { %v2151_v10 = vmul.f32 0.5, %v2150_v8 }
 0xce9   : > { %v2152_v60 = vsub.f32 1.5, %v2151_v10 }
 0xceb   : > { %v2153_v56 = vmul.f32 %v2740_v3, %v2152_v60 }
 0xced   : > { %v2157_v17 = vsel %vm2156_vm8, %v2740_v3, %v2153_v56 }
 0xcee   : > { %v2158_v63 = vmul.f32 %v2157_v17, %v2141_v1 }
 0xcf0   : > { %v2160_v9 = vmul.f32 %v2705_v22, %v2158_v63 }
 0xcf2   : > { %v2162_v15 = vadd.f32 %v2706_v4, %v2160_v9 }
 0xcf4   : > { %2163 = vst.msk [vmem:[%s489_s22] sm:$0xff] %vm524_vm0, %v2162_v15 }
 0xcf5   : > { %2796 = shalt.err (!%p2793_p12)
}
 0xcf6   : > { %2623 = dma.vmem_to_hbm [thread:$0]  (%p2968_p5), %s2183_s1, 128, %s2185_s26, %s2165_s30  }
 0xcf7 PF: > { %p2634_p13 = scmp.ge.s32.totalorder %s2835_s21, 2  ;;  %s2213_s27 = sand.u32 1, %s2823_s18  }
 0xcf8   : > { %s2214_s23 = scalar_lea.sflag [#allocation3], %s2213_s27 }
 0xcf9   : > { %p2628_p0 = pnand %p2634_p13, %p2972_p6 }
 0xcfb   : > { %p2629_p1 = pneg %p2628_p0 }
 0xcfd   : > { %2814 = dma.done.wait (%p2629_p1), %s2214_s23, 128  }
 0xcfe   : > { %2816 = vsyncadd (%p2629_p1), %s2214_s23, 4294967168  ;;  %s2224_s20 = scalar_lea.sflag [#allocation5], %s2213_s27 }
 0xcff   : > { %2818 = dma.done.wait (%p2629_p1), %s2224_s20, 256  }
 0xd00   : > { %2820 = vsyncadd (%p2629_p1), %s2224_s20, 4294967040  ;;  %s3917_s21 = sld [smem:[#allocation9_spill]]  ;;  %s3920_s18 = smov %s2827_s19 }
 0xd01   : > { %s3918_s24 = sld [smem:[#allocation8_spill]] }
 0xd02   : > { %s3919_s20 = sld [smem:[#allocation10_spill]] }
 0xd06   : > { %p29_p5 = scmp.ge.s32.totalorder %s3917_s21, 4  }
 0xd07   : > { %s3921_s19 = smov %s3918_s24 }
 0xd08   :  { %31 = sbr.rel (!%p29_p5) target bundleno = 13 (0xd), region = 133 }
 0xd0d   :  { %2230 = vsyncpa [#allocation3], 1 }
 0xd0e   :  { %2232 = vsyncpa [#allocation3 + $0x1], 1 }
 0xd0f   :  { %2233 = vsyncpa [#allocation5], 1 }
 0xd10   :  { %2235 = vsyncpa [#allocation5 + $0x1], 1 }

</bundles_post_ra>
